<compile_context>
chip_gen: v7x
topology: tpu7x:2x2x1
jax: 0.10.0
libtpu: 0.0.40
codegen_flags: <defaults>
</compile_context>

<pallas_src>
import functools
import math

import jax
import jax.numpy as jnp
from jax.experimental import pallas as pl
from jax.experimental.pallas import tpu as pltpu

# ---------------- small synthetic BERT config ----------------
VOCAB = 50
MAX_POS = 64
TYPE_VOCAB = 2
HIDDEN = 32
NUM_LAYERS = 2
NUM_HEADS = 2
HEAD_DIM = HIDDEN // NUM_HEADS
INTERMEDIATE = 64
NUM_LABELS = 3
NUM_SOFT_TOKENS = 4
LN_EPS = 1e-12
NEG_INF = -1e9

OUT_ROWS, OUT_LANES = 8, 128   # lane-dense output slab


def _round_up(x, m):
    return ((x + m - 1) // m) * m


# ---------------- fused whole-model Pallas kernel ----------------
def _bert_fused_kernel(
    # per-example inputs
    ids_ref,      # (B*S, 1) int32  input token ids
    tt_ref,       # (B*S, 1) int32  token type ids (real tokens only)
    am_ref,       # (B, S)   f32    attention mask (real tokens only)
    labels_ref,   # (B, 1)   int32  labels
    # embedding tables / LN
    word_ref,     # (VOCAB, H)
    pos_ref,      # (MAX_POS, H)
    type_ref,     # (TYPE_VOCAB, H)
    emb_g_ref, emb_b_ref,     # (1, H) embedding LayerNorm params
    sp_ref,       # (P, H)   soft prompts
    # stacked encoder weights (static layer index inside kernel)
    wqkv_ref, bqkv_ref,       # (L, H, 3H), (L, 1, 3H)   fused Q|K|V
    wo_ref, bo_ref,           # (L, H, H),  (L, 1, H)
    ln1_g_ref, ln1_b_ref,     # (L, 1, H)
    wi_ref, bi_ref,           # (L, H, I),  (L, 1, I)
    wf_ref, bf_ref,           # (L, I, H),  (L, 1, H)
    ln2_g_ref, ln2_b_ref,     # (L, 1, H)
    # head
    wp_ref, bp_ref,           # (H, H), (1, H)   pooler
    wc_ref, bc_ref,           # (H, C), (1, C)   classifier
    # output
    out_ref,                  # (8, 128) lane-dense slab: rows 0..B-1 logits, row B loss
    *, B, S):
    H = HIDDEN
    P = NUM_SOFT_TOKENS
    T = P + S
    T_pad = _round_up(T, 8)          # sublane-aligned sequence length
    N = B * T_pad                    # flattened, per-batch blocks 8-aligned
    dH = HEAD_DIM
    C = NUM_LABELS
    scale = 1.0 / math.sqrt(dH)
    inv_sqrt2 = 1.0 / math.sqrt(2.0)
    f32 = jnp.float32

    def layer_norm(z, g, b):
        mean = jnp.mean(z, axis=-1, keepdims=True)
        var = jnp.mean((z - mean) ** 2, axis=-1, keepdims=True)
        return (z - mean) * jax.lax.rsqrt(var + LN_EPS) * g + b

    emb_g = emb_g_ref[...]
    emb_b = emb_b_ref[...]
    pos = pos_ref[...]                       # (MAX_POS, H)
    type_tab = type_ref[...]                 # (2, H)
    type0 = type_tab[0:1, :]                 # (1, H)
    type1 = type_tab[1:2, :]                 # (1, H)

    # --- BertEmbeddings pass 1 on input_ids: one-hot gather on the MXU ---
    ids = ids_ref[...]                                                     # (B*S, 1)
    onehot_w = (jax.lax.broadcasted_iota(jnp.int32, (B * S, VOCAB), 1)
                == ids).astype(f32)                                        # (B*S, VOCAB)
    wemb = jnp.dot(onehot_w, word_ref[...], preferred_element_type=f32)    # (B*S, H)
    emb1 = wemb.reshape(B, S, H) + pos[:S][None] + type0[None]
    x1 = layer_norm(emb1, emb_g, emb_b)                                    # (B, S, H)

    # Pass-2 token-type embedding for the real-token rows (prompt/pad rows use type 0,
    # which is added to the full sequence below) via a 0/1 blend — no gather.
    ttf = tt_ref[...].astype(f32)                                          # (B*S, 1)
    x1 = x1 + (ttf * (type1 - type0)).reshape(B, S, H)

    # --- SoftPrompt prepend + pad to T_pad (per-batch blocks stay 8-aligned) ---
    sp_b = jnp.broadcast_to(sp_ref[...][None], (B, P, H))                  # (B, P, H)
    pieces = [sp_b, x1]
    if T_pad > T:
        pieces.append(jnp.zeros((B, T_pad - T, H), f32))
    x2 = jnp.concatenate(pieces, axis=1)                                   # (B, T_pad, H)

    # --- BertEmbeddings pass 2 on inputs_embeds: +pos (broadcast), +type0, LayerNorm ---
    x2 = x2 + pos[:T_pad][None] + type0[None]
    x = layer_norm(x2, emb_g, emb_b).reshape(N, H)                         # (N, H)

    # --- block-diagonal additive attention mask, built ONCE before the layer loop ---
    am = am_ref[...]                                                       # (B, S)
    kparts = []
    for b in range(B):
        kparts.append(jnp.ones((1, P), f32))        # prompts attendable
        kparts.append(am[b:b + 1, :])               # real tokens per mask
        if T_pad > T:
            kparts.append(jnp.zeros((1, T_pad - T), f32))   # pad keys masked
    kvalid = jnp.concatenate(kparts, axis=1)                               # (1, N)
    col_add = (1.0 - kvalid) * NEG_INF                                     # (1, N)
    # per-row / per-column batch ids (constants), off-diagonal batch blocks -> -1e9
    rb_col = jnp.concatenate([jnp.full((T_pad, 1), float(b), f32) for b in range(B)],
                             axis=0)                                       # (N, 1)
    cb_row = jnp.concatenate([jnp.full((1, T_pad), float(b), f32) for b in range(B)],
                             axis=1)                                       # (1, N)
    mask_full = jnp.where(rb_col == cb_row, 0.0, NEG_INF) + col_add        # (N, N)

    # --- encoder layers (statically unrolled; weights sliced from VMEM stacks) ---
    for l in range(NUM_LAYERS):
        # fused QKV projection: one (N,H) @ (H,3H) matmul for the whole batch
        qkv = jnp.dot(x, wqkv_ref[l], preferred_element_type=f32) + bqkv_ref[l]
        head_outs = []
        for h in range(NUM_HEADS):
            q = qkv[:, h * dH:(h + 1) * dH]                 # (N, dH)
            k = qkv[:, H + h * dH:H + (h + 1) * dH]         # (N, dH)
            v = qkv[:, 2 * H + h * dH:2 * H + (h + 1) * dH]
            # whole-batch scores with block-diagonal mask (cross-batch weights -> 0)
            s = jax.lax.dot_general(q, k, (((1,), (1,)), ((), ())),
                                    preferred_element_type=f32) * scale + mask_full
            s = s - jnp.max(s, axis=-1, keepdims=True)
            p = jnp.exp(s)
            p = p / jnp.sum(p, axis=-1, keepdims=True)      # exact softmax denom
            head_outs.append(jnp.dot(p, v, preferred_element_type=f32))
        ctx = jnp.concatenate(head_outs, axis=1)            # (N, H)

        attn_out = jnp.dot(ctx, wo_ref[l], preferred_element_type=f32) + bo_ref[l]
        x = layer_norm(attn_out + x, ln1_g_ref[l], ln1_b_ref[l])

        inter = jnp.dot(x, wi_ref[l], preferred_element_type=f32) + bi_ref[l]
        # exact (erf) GELU, matching HF BERT "gelu"
        inter = 0.5 * inter * (1.0 + jax.scipy.special.erf(inter * inv_sqrt2))
        ffn = jnp.dot(inter, wf_ref[l], preferred_element_type=f32) + bf_ref[l]
        x = layer_norm(ffn + x, ln2_g_ref[l], ln2_b_ref[l])

    # --- pooler on [CLS] (row b*T_pad, 8-aligned), classifier ---
    cls = jnp.concatenate([x[b * T_pad:b * T_pad + 1, :] for b in range(B)], axis=0)
    pooled = jnp.tanh(jnp.dot(cls, wp_ref[...], preferred_element_type=f32)
                      + bp_ref[...])
    # TODO(synk): dropout before classifier is identity (inference semantics)
    logits = jnp.dot(pooled, wc_ref[...], preferred_element_type=f32) + bc_ref[...]  # (B,C)

    # --- vectorized cross-entropy (labels as a VMEM column, single iota compare) ---
    m = jnp.max(logits, axis=-1, keepdims=True)
    lse = jnp.log(jnp.sum(jnp.exp(logits - m), axis=-1, keepdims=True)) + m
    logp = logits - lse
    onehot_l = (jax.lax.broadcasted_iota(jnp.int32, (B, C), 1)
                == labels_ref[...]).astype(f32)                            # (B, C)
    nll = -jnp.sum(onehot_l * logp, axis=-1, keepdims=True)                # (B, 1)
    loss = jnp.sum(nll, axis=0, keepdims=True) * (1.0 / B)                 # (1, 1)

    # --- single lane-dense (8,128) output slab: one full-tile store ---
    logits_row = jnp.concatenate(
        [logits, jnp.zeros((B, OUT_LANES - C), f32)], axis=1)              # (B, 128)
    loss_row = jnp.concatenate(
        [loss, jnp.zeros((1, OUT_LANES - 1), f32)], axis=1)                # (1, 128)
    slab_parts = [logits_row, loss_row]
    if OUT_ROWS - B - 1 > 0:
        slab_parts.append(jnp.zeros((OUT_ROWS - B - 1, OUT_LANES), f32))
    out_ref[...] = jnp.concatenate(slab_parts, axis=0)                     # (8, 128)


# ---------------- parameters (deterministic synthetic init, stacked per layer) ----------------
def init_params(key):
    keys = iter(jax.random.split(key, 64))

    def nrm(shape, scale=0.02):
        return scale * jax.random.normal(next(keys), shape, dtype=jnp.float32)

    L, H, I, C = NUM_LAYERS, HIDDEN, INTERMEDIATE, NUM_LABELS
    return {
        "word_emb": nrm((VOCAB, H)),
        "pos_emb": nrm((MAX_POS, H)),
        "type_emb": nrm((TYPE_VOCAB, H)),
        "emb_ln_g": jnp.ones((1, H), jnp.float32),
        "emb_ln_b": jnp.zeros((1, H), jnp.float32),
        # soft prompts: torch.randn -> std 1.0
        "soft_prompts": nrm((NUM_SOFT_TOKENS, H), scale=1.0),
        # fused Q|K|V weights, stacked over layers
        "wqkv": nrm((L, H, 3 * H)), "bqkv": jnp.zeros((L, 1, 3 * H), jnp.float32),
        "wo": nrm((L, H, H)), "bo": jnp.zeros((L, 1, H), jnp.float32),
        "ln1_g": jnp.ones((L, 1, H), jnp.float32),
        "ln1_b": jnp.zeros((L, 1, H), jnp.float32),
        "wi": nrm((L, H, I)), "bi": jnp.zeros((L, 1, I), jnp.float32),
        "wf": nrm((L, I, H)), "bf": jnp.zeros((L, 1, H), jnp.float32),
        "ln2_g": jnp.ones((L, 1, H), jnp.float32),
        "ln2_b": jnp.zeros((L, 1, H), jnp.float32),
        "wp": nrm((H, H)), "bp": jnp.zeros((1, H), jnp.float32),
        "wc": nrm((H, C)), "bc": jnp.zeros((1, C), jnp.float32),
    }


# ---------------- forward ----------------
def forward(params, input_ids, attention_mask, token_type_ids, labels):
    B, S = input_ids.shape
    T_pad = _round_up(NUM_SOFT_TOKENS + S, 8)
    assert T_pad <= MAX_POS and B + 1 <= OUT_ROWS and NUM_LABELS <= OUT_LANES

    # Only trivial reshapes/casts remain in XLA; embedding gathers, mask construction
    # and the loss all run inside the single fused Pallas kernel.
    ids_col = input_ids.reshape(B * S, 1).astype(jnp.int32)
    tt_col = token_type_ids.reshape(B * S, 1).astype(jnp.int32)
    am = attention_mask.astype(jnp.float32)
    labels_col = labels.reshape(B, 1).astype(jnp.int32)

    args = (
        ids_col, tt_col, am, labels_col,
        params["word_emb"], params["pos_emb"], params["type_emb"],
        params["emb_ln_g"], params["emb_ln_b"], params["soft_prompts"],
        params["wqkv"], params["bqkv"], params["wo"], params["bo"],
        params["ln1_g"], params["ln1_b"],
        params["wi"], params["bi"], params["wf"], params["bf"],
        params["ln2_g"], params["ln2_b"],
        params["wp"], params["bp"], params["wc"], params["bc"],
    )

    kernel = functools.partial(_bert_fused_kernel, B=B, S=S)
    out = pl.pallas_call(
        kernel,
        out_shape=jax.ShapeDtypeStruct((OUT_ROWS, OUT_LANES), jnp.float32),
        in_specs=[pl.BlockSpec(memory_space=pltpu.MemorySpace.VMEM)] * len(args),
        out_specs=pl.BlockSpec(memory_space=pltpu.MemorySpace.VMEM),
    )(*args)

    logits = out[:B, :NUM_LABELS]
    loss = out[B, 0]
    return loss, logits


if __name__ == "__main__":
    root = jax.random.PRNGKey(0)
    pkey, ikey = jax.random.split(root)
    params = init_params(pkey)

    B, S = 2, 8
    input_ids = jax.random.randint(ikey, (B, S), 0, VOCAB, dtype=jnp.int32)
    attention_mask = jnp.ones((B, S), dtype=jnp.float32).at[1, -2:].set(0.0)
    token_type_ids = jnp.zeros((B, S), dtype=jnp.int32).at[:, S // 2:].set(1)
    labels = jnp.array([0, 2], dtype=jnp.int32)

    fwd = jax.jit(forward)
    loss, logits = fwd(params, input_ids, attention_mask, token_type_ids, labels)
    jax.block_until_ready((loss, logits))
    assert logits.shape == (B, NUM_LABELS)
    assert loss.shape == ()
    print("KERNEL_OK")
</pallas_src>

<mosaic_0001>
module attributes {stable_mosaic.version = 11 : i64} {
  func.func @_bert_fused_kernel(%arg0: memref<16x1xi32, #tpu.memory_space<vmem>>, %arg1: memref<16x1xi32, #tpu.memory_space<vmem>>, %arg2: memref<2x8xf32, #tpu.memory_space<vmem>>, %arg3: memref<2x1xi32, #tpu.memory_space<vmem>>, %arg4: memref<50x32xf32, #tpu.memory_space<vmem>>, %arg5: memref<64x32xf32, #tpu.memory_space<vmem>>, %arg6: memref<2x32xf32, #tpu.memory_space<vmem>>, %arg7: memref<1x32xf32, #tpu.memory_space<vmem>>, %arg8: memref<1x32xf32, #tpu.memory_space<vmem>>, %arg9: memref<4x32xf32, #tpu.memory_space<vmem>>, %arg10: memref<2x32x96xf32, #tpu.memory_space<vmem>>, %arg11: memref<2x1x96xf32, #tpu.memory_space<vmem>>, %arg12: memref<2x32x32xf32, #tpu.memory_space<vmem>>, %arg13: memref<2x1x32xf32, #tpu.memory_space<vmem>>, %arg14: memref<2x1x32xf32, #tpu.memory_space<vmem>>, %arg15: memref<2x1x32xf32, #tpu.memory_space<vmem>>, %arg16: memref<2x32x64xf32, #tpu.memory_space<vmem>>, %arg17: memref<2x1x64xf32, #tpu.memory_space<vmem>>, %arg18: memref<2x64x32xf32, #tpu.memory_space<vmem>>, %arg19: memref<2x1x32xf32, #tpu.memory_space<vmem>>, %arg20: memref<2x1x32xf32, #tpu.memory_space<vmem>>, %arg21: memref<2x1x32xf32, #tpu.memory_space<vmem>>, %arg22: memref<32x32xf32, #tpu.memory_space<vmem>>, %arg23: memref<1x32xf32, #tpu.memory_space<vmem>>, %arg24: memref<32x3xf32, #tpu.memory_space<vmem>>, %arg25: memref<1x3xf32, #tpu.memory_space<vmem>>, %arg26: memref<8x128xf32, #tpu.memory_space<vmem>>) attributes {dimension_semantics = [], scalar_prefetch = 0 : i64, scratch_operands = 0 : i64, tpu.core_type = #tpu.core_type<tc>} {
    %c0 = arith.constant 0 : index
    %c0_0 = arith.constant 0 : index
    %0 = vector.load %arg7[%c0, %c0_0] : memref<1x32xf32, #tpu.memory_space<vmem>>, vector<1x32xf32>
    %c0_1 = arith.constant 0 : index
    %c0_2 = arith.constant 0 : index
    %1 = vector.load %arg8[%c0_1, %c0_2] : memref<1x32xf32, #tpu.memory_space<vmem>>, vector<1x32xf32>
    %c0_3 = arith.constant 0 : index
    %c0_4 = arith.constant 0 : index
    %2 = vector.load %arg5[%c0_3, %c0_4] : memref<64x32xf32, #tpu.memory_space<vmem>>, vector<64x32xf32>
    %c0_5 = arith.constant 0 : index
    %c0_6 = arith.constant 0 : index
    %3 = vector.load %arg6[%c0_5, %c0_6] : memref<2x32xf32, #tpu.memory_space<vmem>>, vector<2x32xf32>
    %4 = vector.extract_strided_slice %3 {offsets = [0, 0], sizes = [1, 32], strides = [1, 1]} : vector<2x32xf32> to vector<1x32xf32>
    %5 = vector.extract_strided_slice %3 {offsets = [1, 0], sizes = [1, 32], strides = [1, 1]} : vector<2x32xf32> to vector<1x32xf32>
    %c0_7 = arith.constant 0 : index
    %c0_8 = arith.constant 0 : index
    %6 = vector.load %arg0[%c0_7, %c0_8] : memref<16x1xi32, #tpu.memory_space<vmem>>, vector<16x1xi32>
    %7 = tpu.iota {dimensions = array<i32: 1>} : vector<16x50xi32>
    %8 = vector.broadcast %6 : vector<16x1xi32> to vector<16x50xi32>
    %9 = arith.cmpi eq, %7, %8 : vector<16x50xi32>
    %10 = arith.extui %9 : vector<16x50xi1> to vector<16x50xi32>
    %11 = arith.sitofp %10 : vector<16x50xi32> to vector<16x50xf32>
    %c0_9 = arith.constant 0 : index
    %c0_10 = arith.constant 0 : index
    %12 = vector.load %arg4[%c0_9, %c0_10] : memref<50x32xf32, #tpu.memory_space<vmem>>, vector<50x32xf32>
    %cst = arith.constant dense<0.000000e+00> : vector<16x32xf32>
    %13 = tpu.matmul %11, %12, %cst {dimension_numbers = #tpu.dot_dimension_numbers<[1], [0], [0], [1], [0, 0, 1, 1], [], []>} : vector<16x50xf32>, vector<50x32xf32>, vector<16x32xf32> -> vector<16x32xf32>
    %14 = vector.shape_cast %13 : vector<16x32xf32> to vector<2x8x32xf32>
    %15 = vector.extract_strided_slice %2 {offsets = [0, 0], sizes = [8, 32], strides = [1, 1]} : vector<64x32xf32> to vector<8x32xf32>
    %16 = vector.shape_cast %15 : vector<8x32xf32> to vector<1x8x32xf32>
    %17 = vector.broadcast %16 : vector<1x8x32xf32> to vector<2x8x32xf32>
    %18 = arith.addf %14, %17 : vector<2x8x32xf32>
    %19 = vector.shape_cast %4 : vector<1x32xf32> to vector<1x1x32xf32>
    %20 = vector.broadcast %19 : vector<1x1x32xf32> to vector<2x8x32xf32>
    %21 = arith.addf %18, %20 : vector<2x8x32xf32>
    %cst_11 = arith.constant dense<0.000000e+00> : vector<2x8xf32>
    %22 = vector.multi_reduction <add>, %21, %cst_11 [2] : vector<2x8x32xf32> to vector<2x8xf32>
    %23 = vector.shape_cast %22 : vector<2x8xf32> to vector<2x8x1xf32>
    %cst_12 = arith.constant 3.200000e+01 : f32
    %24 = vector.broadcast %cst_12 : f32 to vector<2x8x1xf32>
    %25 = arith.divf %23, %24 : vector<2x8x1xf32>
    %26 = vector.broadcast %25 : vector<2x8x1xf32> to vector<2x8x32xf32>
    %27 = arith.subf %21, %26 : vector<2x8x32xf32>
    %28 = arith.mulf %27, %27 : vector<2x8x32xf32>
    %cst_13 = arith.constant dense<0.000000e+00> : vector<2x8xf32>
    %29 = vector.multi_reduction <add>, %28, %cst_13 [2] : vector<2x8x32xf32> to vector<2x8xf32>
    %30 = vector.shape_cast %29 : vector<2x8xf32> to vector<2x8x1xf32>
    %cst_14 = arith.constant 3.200000e+01 : f32
    %31 = vector.broadcast %cst_14 : f32 to vector<2x8x1xf32>
    %32 = arith.divf %30, %31 : vector<2x8x1xf32>
    %33 = vector.broadcast %25 : vector<2x8x1xf32> to vector<2x8x32xf32>
    %34 = arith.subf %21, %33 : vector<2x8x32xf32>
    %cst_15 = arith.constant 9.99999996E-13 : f32
    %35 = vector.broadcast %cst_15 : f32 to vector<2x8x1xf32>
    %36 = arith.addf %32, %35 : vector<2x8x1xf32>
    %37 = math.rsqrt %36 : vector<2x8x1xf32>
    %38 = vector.broadcast %37 : vector<2x8x1xf32> to vector<2x8x32xf32>
    %39 = arith.mulf %34, %38 : vector<2x8x32xf32>
    %40 = vector.shape_cast %0 : vector<1x32xf32> to vector<1x1x32xf32>
    %41 = vector.broadcast %40 : vector<1x1x32xf32> to vector<2x8x32xf32>
    %42 = arith.mulf %39, %41 : vector<2x8x32xf32>
    %43 = vector.shape_cast %1 : vector<1x32xf32> to vector<1x1x32xf32>
    %44 = vector.broadcast %43 : vector<1x1x32xf32> to vector<2x8x32xf32>
    %45 = arith.addf %42, %44 : vector<2x8x32xf32>
    %c0_16 = arith.constant 0 : index
    %c0_17 = arith.constant 0 : index
    %46 = vector.load %arg1[%c0_16, %c0_17] : memref<16x1xi32, #tpu.memory_space<vmem>>, vector<16x1xi32>
    %47 = arith.sitofp %46 : vector<16x1xi32> to vector<16x1xf32>
    %48 = arith.subf %5, %4 : vector<1x32xf32>
    %49 = vector.broadcast %47 : vector<16x1xf32> to vector<16x32xf32>
    %50 = vector.broadcast %48 : vector<1x32xf32> to vector<16x32xf32>
    %51 = arith.mulf %49, %50 : vector<16x32xf32>
    %52 = vector.shape_cast %51 : vector<16x32xf32> to vector<2x8x32xf32>
    %53 = arith.addf %45, %52 : vector<2x8x32xf32>
    %c0_18 = arith.constant 0 : index
    %c0_19 = arith.constant 0 : index
    %54 = vector.load %arg9[%c0_18, %c0_19] : memref<4x32xf32, #tpu.memory_space<vmem>>, vector<4x32xf32>
    %55 = vector.shape_cast %54 : vector<4x32xf32> to vector<1x4x32xf32>
    %56 = vector.shape_cast %55 : vector<1x4x32xf32> to vector<1x4x32xf32>
    %57 = vector.broadcast %56 : vector<1x4x32xf32> to vector<2x4x32xf32>
    %cst_20 = arith.constant 0.000000e+00 : f32
    %58 = vector.broadcast %cst_20 : f32 to vector<2x4x32xf32>
    %59 = tpu.concatenate %57, %53, %58 in 1 : vector<2x4x32xf32>, vector<2x8x32xf32>, vector<2x4x32xf32> -> vector<2x16x32xf32>
    %60 = vector.extract_strided_slice %2 {offsets = [0, 0], sizes = [16, 32], strides = [1, 1]} : vector<64x32xf32> to vector<16x32xf32>
    %61 = vector.shape_cast %60 : vector<16x32xf32> to vector<1x16x32xf32>
    %62 = vector.broadcast %61 : vector<1x16x32xf32> to vector<2x16x32xf32>
    %63 = arith.addf %59, %62 : vector<2x16x32xf32>
    %64 = vector.shape_cast %4 : vector<1x32xf32> to vector<1x1x32xf32>
    %65 = vector.broadcast %64 : vector<1x1x32xf32> to vector<2x16x32xf32>
    %66 = arith.addf %63, %65 : vector<2x16x32xf32>
    %cst_21 = arith.constant dense<0.000000e+00> : vector<2x16xf32>
    %67 = vector.multi_reduction <add>, %66, %cst_21 [2] : vector<2x16x32xf32> to vector<2x16xf32>
    %68 = vector.shape_cast %67 : vector<2x16xf32> to vector<2x16x1xf32>
    %cst_22 = arith.constant 3.200000e+01 : f32
    %69 = vector.broadcast %cst_22 : f32 to vector<2x16x1xf32>
    %70 = arith.divf %68, %69 : vector<2x16x1xf32>
    %71 = vector.broadcast %70 : vector<2x16x1xf32> to vector<2x16x32xf32>
    %72 = arith.subf %66, %71 : vector<2x16x32xf32>
    %73 = arith.mulf %72, %72 : vector<2x16x32xf32>
    %cst_23 = arith.constant dense<0.000000e+00> : vector<2x16xf32>
    %74 = vector.multi_reduction <add>, %73, %cst_23 [2] : vector<2x16x32xf32> to vector<2x16xf32>
    %75 = vector.shape_cast %74 : vector<2x16xf32> to vector<2x16x1xf32>
    %cst_24 = arith.constant 3.200000e+01 : f32
    %76 = vector.broadcast %cst_24 : f32 to vector<2x16x1xf32>
    %77 = arith.divf %75, %76 : vector<2x16x1xf32>
    %78 = vector.broadcast %70 : vector<2x16x1xf32> to vector<2x16x32xf32>
    %79 = arith.subf %66, %78 : vector<2x16x32xf32>
    %cst_25 = arith.constant 9.99999996E-13 : f32
    %80 = vector.broadcast %cst_25 : f32 to vector<2x16x1xf32>
    %81 = arith.addf %77, %80 : vector<2x16x1xf32>
    %82 = math.rsqrt %81 : vector<2x16x1xf32>
    %83 = vector.broadcast %82 : vector<2x16x1xf32> to vector<2x16x32xf32>
    %84 = arith.mulf %79, %83 : vector<2x16x32xf32>
    %85 = vector.shape_cast %0 : vector<1x32xf32> to vector<1x1x32xf32>
    %86 = vector.broadcast %85 : vector<1x1x32xf32> to vector<2x16x32xf32>
    %87 = arith.mulf %84, %86 : vector<2x16x32xf32>
    %88 = vector.shape_cast %1 : vector<1x32xf32> to vector<1x1x32xf32>
    %89 = vector.broadcast %88 : vector<1x1x32xf32> to vector<2x16x32xf32>
    %90 = arith.addf %87, %89 : vector<2x16x32xf32>
    %91 = vector.shape_cast %90 : vector<2x16x32xf32> to vector<32x32xf32>
    %c0_26 = arith.constant 0 : index
    %c0_27 = arith.constant 0 : index
    %92 = vector.load %arg2[%c0_26, %c0_27] : memref<2x8xf32, #tpu.memory_space<vmem>>, vector<2x8xf32>
    %cst_28 = arith.constant 1.000000e+00 : f32
    %93 = vector.broadcast %cst_28 : f32 to vector<1x4xf32>
    %94 = vector.extract_strided_slice %92 {offsets = [0, 0], sizes = [1, 8], strides = [1, 1]} : vector<2x8xf32> to vector<1x8xf32>
    %cst_29 = arith.constant 0.000000e+00 : f32
    %95 = vector.broadcast %cst_29 : f32 to vector<1x4xf32>
    %cst_30 = arith.constant 1.000000e+00 : f32
    %96 = vector.broadcast %cst_30 : f32 to vector<1x4xf32>
    %97 = vector.extract_strided_slice %92 {offsets = [1, 0], sizes = [1, 8], strides = [1, 1]} : vector<2x8xf32> to vector<1x8xf32>
    %cst_31 = arith.constant 0.000000e+00 : f32
    %98 = vector.broadcast %cst_31 : f32 to vector<1x4xf32>
    %99 = tpu.concatenate %93, %94, %95, %96, %97, %98 in 1 : vector<1x4xf32>, vector<1x8xf32>, vector<1x4xf32>, vector<1x4xf32>, vector<1x8xf32>, vector<1x4xf32> -> vector<1x32xf32>
    %cst_32 = arith.constant 1.000000e+00 : f32
    %100 = vector.broadcast %cst_32 : f32 to vector<1x32xf32>
    %101 = arith.subf %100, %99 : vector<1x32xf32>
    %cst_33 = arith.constant -1.000000e+09 : f32
    %102 = vector.broadcast %cst_33 : f32 to vector<1x32xf32>
    %103 = arith.mulf %101, %102 : vector<1x32xf32>
    %cst_34 = arith.constant 0.000000e+00 : f32
    %104 = vector.broadcast %cst_34 : f32 to vector<16x1xf32>
    %cst_35 = arith.constant 1.000000e+00 : f32
    %105 = vector.broadcast %cst_35 : f32 to vector<16x1xf32>
    %106 = tpu.concatenate %104, %105 in 0 : vector<16x1xf32>, vector<16x1xf32> -> vector<32x1xf32>
    %cst_36 = arith.constant 0.000000e+00 : f32
    %107 = vector.broadcast %cst_36 : f32 to vector<1x16xf32>
    %cst_37 = arith.constant 1.000000e+00 : f32
    %108 = vector.broadcast %cst_37 : f32 to vector<1x16xf32>
    %109 = tpu.concatenate %107, %108 in 1 : vector<1x16xf32>, vector<1x16xf32> -> vector<1x32xf32>
    %110 = vector.broadcast %106 : vector<32x1xf32> to vector<32x32xf32>
    %111 = vector.broadcast %109 : vector<1x32xf32> to vector<32x32xf32>
    %112 = arith.cmpf oeq, %110, %111 : vector<32x32xf32>
    %cst_38 = arith.constant 0.000000e+00 : f32
    %cst_39 = arith.constant -1.000000e+09 : f32
    %113 = vector.broadcast %cst_38 : f32 to vector<32x32xf32>
    %114 = vector.broadcast %cst_39 : f32 to vector<32x32xf32>
    %115 = arith.select %112, %113, %114 : vector<32x32xi1>, vector<32x32xf32>
    %116 = vector.broadcast %103 : vector<1x32xf32> to vector<32x32xf32>
    %117 = arith.addf %115, %116 : vector<32x32xf32>
    %c0_40 = arith.constant 0 : index
    %c0_41 = arith.constant 0 : index
    %c0_42 = arith.constant 0 : index
    %118 = vector.load %arg10[%c0_40, %c0_41, %c0_42] : memref<2x32x96xf32, #tpu.memory_space<vmem>>, vector<1x32x96xf32>
    %119 = vector.shape_cast %118 : vector<1x32x96xf32> to vector<32x96xf32>
    %cst_43 = arith.constant dense<0.000000e+00> : vector<32x96xf32>
    %120 = tpu.matmul %91, %119, %cst_43 {dimension_numbers = #tpu.dot_dimension_numbers<[1], [0], [0], [1], [0, 0, 1, 1], [], []>} : vector<32x32xf32>, vector<32x96xf32>, vector<32x96xf32> -> vector<32x96xf32>
    %c0_44 = arith.constant 0 : index
    %c0_45 = arith.constant 0 : index
    %c0_46 = arith.constant 0 : index
    %121 = vector.load %arg11[%c0_44, %c0_45, %c0_46] : memref<2x1x96xf32, #tpu.memory_space<vmem>>, vector<1x1x96xf32>
    %122 = vector.shape_cast %121 : vector<1x1x96xf32> to vector<1x96xf32>
    %123 = vector.broadcast %122 : vector<1x96xf32> to vector<32x96xf32>
    %124 = arith.addf %120, %123 : vector<32x96xf32>
    %125 = vector.extract_strided_slice %124 {offsets = [0, 0], sizes = [32, 16], strides = [1, 1]} : vector<32x96xf32> to vector<32x16xf32>
    %126 = vector.extract_strided_slice %124 {offsets = [0, 32], sizes = [32, 16], strides = [1, 1]} : vector<32x96xf32> to vector<32x16xf32>
    %127 = vector.extract_strided_slice %124 {offsets = [0, 64], sizes = [32, 16], strides = [1, 1]} : vector<32x96xf32> to vector<32x16xf32>
    %cst_47 = arith.constant dense<0.000000e+00> : vector<32x32xf32>
    %128 = tpu.matmul %125, %126, %cst_47 {dimension_numbers = #tpu.dot_dimension_numbers<[1], [1], [0], [0], [0, 0, 1, 0], [], []>} : vector<32x16xf32>, vector<32x16xf32>, vector<32x32xf32> -> vector<32x32xf32>
    %cst_48 = arith.constant 2.500000e-01 : f32
    %129 = vector.broadcast %cst_48 : f32 to vector<32x32xf32>
    %130 = arith.mulf %128, %129 : vector<32x32xf32>
    %131 = arith.addf %130, %117 : vector<32x32xf32>
    %cst_49 = arith.constant dense<0xFF800000> : vector<32xf32>
    %132 = vector.multi_reduction <maximumf>, %131, %cst_49 [1] : vector<32x32xf32> to vector<32xf32>
    %133 = vector.shape_cast %132 : vector<32xf32> to vector<32x1xf32>
    %134 = vector.broadcast %133 : vector<32x1xf32> to vector<32x32xf32>
    %135 = arith.subf %131, %134 : vector<32x32xf32>
    %136 = math.exp %135 : vector<32x32xf32>
    %cst_50 = arith.constant dense<0.000000e+00> : vector<32xf32>
    %137 = vector.multi_reduction <add>, %136, %cst_50 [1] : vector<32x32xf32> to vector<32xf32>
    %138 = vector.shape_cast %137 : vector<32xf32> to vector<32x1xf32>
    %139 = vector.broadcast %138 : vector<32x1xf32> to vector<32x32xf32>
    %140 = arith.divf %136, %139 : vector<32x32xf32>
    %cst_51 = arith.constant dense<0.000000e+00> : vector<32x16xf32>
    %141 = tpu.matmul %140, %127, %cst_51 {dimension_numbers = #tpu.dot_dimension_numbers<[1], [0], [0], [1], [0, 0, 1, 1], [], []>} : vector<32x32xf32>, vector<32x16xf32>, vector<32x16xf32> -> vector<32x16xf32>
    %142 = vector.extract_strided_slice %124 {offsets = [0, 16], sizes = [32, 16], strides = [1, 1]} : vector<32x96xf32> to vector<32x16xf32>
    %143 = vector.extract_strided_slice %124 {offsets = [0, 48], sizes = [32, 16], strides = [1, 1]} : vector<32x96xf32> to vector<32x16xf32>
    %144 = vector.extract_strided_slice %124 {offsets = [0, 80], sizes = [32, 16], strides = [1, 1]} : vector<32x96xf32> to vector<32x16xf32>
    %cst_52 = arith.constant dense<0.000000e+00> : vector<32x32xf32>
    %145 = tpu.matmul %142, %143, %cst_52 {dimension_numbers = #tpu.dot_dimension_numbers<[1], [1], [0], [0], [0, 0, 1, 0], [], []>} : vector<32x16xf32>, vector<32x16xf32>, vector<32x32xf32> -> vector<32x32xf32>
    %cst_53 = arith.constant 2.500000e-01 : f32
    %146 = vector.broadcast %cst_53 : f32 to vector<32x32xf32>
    %147 = arith.mulf %145, %146 : vector<32x32xf32>
    %148 = arith.addf %147, %117 : vector<32x32xf32>
    %cst_54 = arith.constant dense<0xFF800000> : vector<32xf32>
    %149 = vector.multi_reduction <maximumf>, %148, %cst_54 [1] : vector<32x32xf32> to vector<32xf32>
    %150 = vector.shape_cast %149 : vector<32xf32> to vector<32x1xf32>
    %151 = vector.broadcast %150 : vector<32x1xf32> to vector<32x32xf32>
    %152 = arith.subf %148, %151 : vector<32x32xf32>
    %153 = math.exp %152 : vector<32x32xf32>
    %cst_55 = arith.constant dense<0.000000e+00> : vector<32xf32>
    %154 = vector.multi_reduction <add>, %153, %cst_55 [1] : vector<32x32xf32> to vector<32xf32>
    %155 = vector.shape_cast %154 : vector<32xf32> to vector<32x1xf32>
    %156 = vector.broadcast %155 : vector<32x1xf32> to vector<32x32xf32>
    %157 = arith.divf %153, %156 : vector<32x32xf32>
    %cst_56 = arith.constant dense<0.000000e+00> : vector<32x16xf32>
    %158 = tpu.matmul %157, %144, %cst_56 {dimension_numbers = #tpu.dot_dimension_numbers<[1], [0], [0], [1], [0, 0, 1, 1], [], []>} : vector<32x32xf32>, vector<32x16xf32>, vector<32x16xf32> -> vector<32x16xf32>
    %159 = tpu.concatenate %141, %158 in 1 : vector<32x16xf32>, vector<32x16xf32> -> vector<32x32xf32>
    %c0_57 = arith.constant 0 : index
    %c0_58 = arith.constant 0 : index
    %c0_59 = arith.constant 0 : index
    %160 = vector.load %arg12[%c0_57, %c0_58, %c0_59] : memref<2x32x32xf32, #tpu.memory_space<vmem>>, vector<1x32x32xf32>
    %161 = vector.shape_cast %160 : vector<1x32x32xf32> to vector<32x32xf32>
    %cst_60 = arith.constant dense<0.000000e+00> : vector<32x32xf32>
    %162 = tpu.matmul %159, %161, %cst_60 {dimension_numbers = #tpu.dot_dimension_numbers<[1], [0], [0], [1], [0, 0, 1, 1], [], []>} : vector<32x32xf32>, vector<32x32xf32>, vector<32x32xf32> -> vector<32x32xf32>
    %c0_61 = arith.constant 0 : index
    %c0_62 = arith.constant 0 : index
    %c0_63 = arith.constant 0 : index
    %163 = vector.load %arg13[%c0_61, %c0_62, %c0_63] : memref<2x1x32xf32, #tpu.memory_space<vmem>>, vector<1x1x32xf32>
    %164 = vector.shape_cast %163 : vector<1x1x32xf32> to vector<1x32xf32>
    %165 = vector.broadcast %164 : vector<1x32xf32> to vector<32x32xf32>
    %166 = arith.addf %162, %165 : vector<32x32xf32>
    %167 = arith.addf %166, %91 : vector<32x32xf32>
    %c0_64 = arith.constant 0 : index
    %c0_65 = arith.constant 0 : index
    %c0_66 = arith.constant 0 : index
    %168 = vector.load %arg14[%c0_64, %c0_65, %c0_66] : memref<2x1x32xf32, #tpu.memory_space<vmem>>, vector<1x1x32xf32>
    %169 = vector.shape_cast %168 : vector<1x1x32xf32> to vector<1x32xf32>
    %c0_67 = arith.constant 0 : index
    %c0_68 = arith.constant 0 : index
    %c0_69 = arith.constant 0 : index
    %170 = vector.load %arg15[%c0_67, %c0_68, %c0_69] : memref<2x1x32xf32, #tpu.memory_space<vmem>>, vector<1x1x32xf32>
    %171 = vector.shape_cast %170 : vector<1x1x32xf32> to vector<1x32xf32>
    %cst_70 = arith.constant dense<0.000000e+00> : vector<32xf32>
    %172 = vector.multi_reduction <add>, %167, %cst_70 [1] : vector<32x32xf32> to vector<32xf32>
    %173 = vector.shape_cast %172 : vector<32xf32> to vector<32x1xf32>
    %cst_71 = arith.constant 3.200000e+01 : f32
    %174 = vector.broadcast %cst_71 : f32 to vector<32x1xf32>
    %175 = arith.divf %173, %174 : vector<32x1xf32>
    %176 = vector.broadcast %175 : vector<32x1xf32> to vector<32x32xf32>
    %177 = arith.subf %167, %176 : vector<32x32xf32>
    %178 = arith.mulf %177, %177 : vector<32x32xf32>
    %cst_72 = arith.constant dense<0.000000e+00> : vector<32xf32>
    %179 = vector.multi_reduction <add>, %178, %cst_72 [1] : vector<32x32xf32> to vector<32xf32>
    %180 = vector.shape_cast %179 : vector<32xf32> to vector<32x1xf32>
    %cst_73 = arith.constant 3.200000e+01 : f32
    %181 = vector.broadcast %cst_73 : f32 to vector<32x1xf32>
    %182 = arith.divf %180, %181 : vector<32x1xf32>
    %183 = vector.broadcast %175 : vector<32x1xf32> to vector<32x32xf32>
    %184 = arith.subf %167, %183 : vector<32x32xf32>
    %cst_74 = arith.constant 9.99999996E-13 : f32
    %185 = vector.broadcast %cst_74 : f32 to vector<32x1xf32>
    %186 = arith.addf %182, %185 : vector<32x1xf32>
    %187 = math.rsqrt %186 : vector<32x1xf32>
    %188 = vector.broadcast %187 : vector<32x1xf32> to vector<32x32xf32>
    %189 = arith.mulf %184, %188 : vector<32x32xf32>
    %190 = vector.broadcast %169 : vector<1x32xf32> to vector<32x32xf32>
    %191 = arith.mulf %189, %190 : vector<32x32xf32>
    %192 = vector.broadcast %171 : vector<1x32xf32> to vector<32x32xf32>
    %193 = arith.addf %191, %192 : vector<32x32xf32>
    %c0_75 = arith.constant 0 : index
    %c0_76 = arith.constant 0 : index
    %c0_77 = arith.constant 0 : index
    %194 = vector.load %arg16[%c0_75, %c0_76, %c0_77] : memref<2x32x64xf32, #tpu.memory_space<vmem>>, vector<1x32x64xf32>
    %195 = vector.shape_cast %194 : vector<1x32x64xf32> to vector<32x64xf32>
    %cst_78 = arith.constant dense<0.000000e+00> : vector<32x64xf32>
    %196 = tpu.matmul %193, %195, %cst_78 {dimension_numbers = #tpu.dot_dimension_numbers<[1], [0], [0], [1], [0, 0, 1, 1], [], []>} : vector<32x32xf32>, vector<32x64xf32>, vector<32x64xf32> -> vector<32x64xf32>
    %c0_79 = arith.constant 0 : index
    %c0_80 = arith.constant 0 : index
    %c0_81 = arith.constant 0 : index
    %197 = vector.load %arg17[%c0_79, %c0_80, %c0_81] : memref<2x1x64xf32, #tpu.memory_space<vmem>>, vector<1x1x64xf32>
    %198 = vector.shape_cast %197 : vector<1x1x64xf32> to vector<1x64xf32>
    %199 = vector.broadcast %198 : vector<1x64xf32> to vector<32x64xf32>
    %200 = arith.addf %196, %199 : vector<32x64xf32>
    %cst_82 = arith.constant 5.000000e-01 : f32
    %201 = vector.broadcast %cst_82 : f32 to vector<32x64xf32>
    %202 = arith.mulf %201, %200 : vector<32x64xf32>
    %cst_83 = arith.constant 0.707106769 : f32
    %203 = vector.broadcast %cst_83 : f32 to vector<32x64xf32>
    %204 = arith.mulf %200, %203 : vector<32x64xf32>
    %205 = math.erf %204 : vector<32x64xf32>
    %cst_84 = arith.constant 1.000000e+00 : f32
    %206 = vector.broadcast %cst_84 : f32 to vector<32x64xf32>
    %207 = arith.addf %206, %205 : vector<32x64xf32>
    %208 = arith.mulf %202, %207 : vector<32x64xf32>
    %c0_85 = arith.constant 0 : index
    %c0_86 = arith.constant 0 : index
    %c0_87 = arith.constant 0 : index
    %209 = vector.load %arg18[%c0_85, %c0_86, %c0_87] : memref<2x64x32xf32, #tpu.memory_space<vmem>>, vector<1x64x32xf32>
    %210 = vector.shape_cast %209 : vector<1x64x32xf32> to vector<64x32xf32>
    %cst_88 = arith.constant dense<0.000000e+00> : vector<32x32xf32>
    %211 = tpu.matmul %208, %210, %cst_88 {dimension_numbers = #tpu.dot_dimension_numbers<[1], [0], [0], [1], [0, 0, 1, 1], [], []>} : vector<32x64xf32>, vector<64x32xf32>, vector<32x32xf32> -> vector<32x32xf32>
    %c0_89 = arith.constant 0 : index
    %c0_90 = arith.constant 0 : index
    %c0_91 = arith.constant 0 : index
    %212 = vector.load %arg19[%c0_89, %c0_90, %c0_91] : memref<2x1x32xf32, #tpu.memory_space<vmem>>, vector<1x1x32xf32>
    %213 = vector.shape_cast %212 : vector<1x1x32xf32> to vector<1x32xf32>
    %214 = vector.broadcast %213 : vector<1x32xf32> to vector<32x32xf32>
    %215 = arith.addf %211, %214 : vector<32x32xf32>
    %216 = arith.addf %215, %193 : vector<32x32xf32>
    %c0_92 = arith.constant 0 : index
    %c0_93 = arith.constant 0 : index
    %c0_94 = arith.constant 0 : index
    %217 = vector.load %arg20[%c0_92, %c0_93, %c0_94] : memref<2x1x32xf32, #tpu.memory_space<vmem>>, vector<1x1x32xf32>
    %218 = vector.shape_cast %217 : vector<1x1x32xf32> to vector<1x32xf32>
    %c0_95 = arith.constant 0 : index
    %c0_96 = arith.constant 0 : index
    %c0_97 = arith.constant 0 : index
    %219 = vector.load %arg21[%c0_95, %c0_96, %c0_97] : memref<2x1x32xf32, #tpu.memory_space<vmem>>, vector<1x1x32xf32>
    %220 = vector.shape_cast %219 : vector<1x1x32xf32> to vector<1x32xf32>
    %cst_98 = arith.constant dense<0.000000e+00> : vector<32xf32>
    %221 = vector.multi_reduction <add>, %216, %cst_98 [1] : vector<32x32xf32> to vector<32xf32>
    %222 = vector.shape_cast %221 : vector<32xf32> to vector<32x1xf32>
    %cst_99 = arith.constant 3.200000e+01 : f32
    %223 = vector.broadcast %cst_99 : f32 to vector<32x1xf32>
    %224 = arith.divf %222, %223 : vector<32x1xf32>
    %225 = vector.broadcast %224 : vector<32x1xf32> to vector<32x32xf32>
    %226 = arith.subf %216, %225 : vector<32x32xf32>
    %227 = arith.mulf %226, %226 : vector<32x32xf32>
    %cst_100 = arith.constant dense<0.000000e+00> : vector<32xf32>
    %228 = vector.multi_reduction <add>, %227, %cst_100 [1] : vector<32x32xf32> to vector<32xf32>
    %229 = vector.shape_cast %228 : vector<32xf32> to vector<32x1xf32>
    %cst_101 = arith.constant 3.200000e+01 : f32
    %230 = vector.broadcast %cst_101 : f32 to vector<32x1xf32>
    %231 = arith.divf %229, %230 : vector<32x1xf32>
    %232 = vector.broadcast %224 : vector<32x1xf32> to vector<32x32xf32>
    %233 = arith.subf %216, %232 : vector<32x32xf32>
    %cst_102 = arith.constant 9.99999996E-13 : f32
    %234 = vector.broadcast %cst_102 : f32 to vector<32x1xf32>
    %235 = arith.addf %231, %234 : vector<32x1xf32>
    %236 = math.rsqrt %235 : vector<32x1xf32>
    %237 = vector.broadcast %236 : vector<32x1xf32> to vector<32x32xf32>
    %238 = arith.mulf %233, %237 : vector<32x32xf32>
    %239 = vector.broadcast %218 : vector<1x32xf32> to vector<32x32xf32>
    %240 = arith.mulf %238, %239 : vector<32x32xf32>
    %241 = vector.broadcast %220 : vector<1x32xf32> to vector<32x32xf32>
    %242 = arith.addf %240, %241 : vector<32x32xf32>
    %c1 = arith.constant 1 : index
    %c0_103 = arith.constant 0 : index
    %c0_104 = arith.constant 0 : index
    %243 = vector.load %arg10[%c1, %c0_103, %c0_104] : memref<2x32x96xf32, #tpu.memory_space<vmem>>, vector<1x32x96xf32>
    %244 = vector.shape_cast %243 : vector<1x32x96xf32> to vector<32x96xf32>
    %cst_105 = arith.constant dense<0.000000e+00> : vector<32x96xf32>
    %245 = tpu.matmul %242, %244, %cst_105 {dimension_numbers = #tpu.dot_dimension_numbers<[1], [0], [0], [1], [0, 0, 1, 1], [], []>} : vector<32x32xf32>, vector<32x96xf32>, vector<32x96xf32> -> vector<32x96xf32>
    %c1_106 = arith.constant 1 : index
    %c0_107 = arith.constant 0 : index
    %c0_108 = arith.constant 0 : index
    %246 = vector.load %arg11[%c1_106, %c0_107, %c0_108] : memref<2x1x96xf32, #tpu.memory_space<vmem>>, vector<1x1x96xf32>
    %247 = vector.shape_cast %246 : vector<1x1x96xf32> to vector<1x96xf32>
    %248 = vector.broadcast %247 : vector<1x96xf32> to vector<32x96xf32>
    %249 = arith.addf %245, %248 : vector<32x96xf32>
    %250 = vector.extract_strided_slice %249 {offsets = [0, 0], sizes = [32, 16], strides = [1, 1]} : vector<32x96xf32> to vector<32x16xf32>
    %251 = vector.extract_strided_slice %249 {offsets = [0, 32], sizes = [32, 16], strides = [1, 1]} : vector<32x96xf32> to vector<32x16xf32>
    %252 = vector.extract_strided_slice %249 {offsets = [0, 64], sizes = [32, 16], strides = [1, 1]} : vector<32x96xf32> to vector<32x16xf32>
    %cst_109 = arith.constant dense<0.000000e+00> : vector<32x32xf32>
    %253 = tpu.matmul %250, %251, %cst_109 {dimension_numbers = #tpu.dot_dimension_numbers<[1], [1], [0], [0], [0, 0, 1, 0], [], []>} : vector<32x16xf32>, vector<32x16xf32>, vector<32x32xf32> -> vector<32x32xf32>
    %cst_110 = arith.constant 2.500000e-01 : f32
    %254 = vector.broadcast %cst_110 : f32 to vector<32x32xf32>
    %255 = arith.mulf %253, %254 : vector<32x32xf32>
    %256 = arith.addf %255, %117 : vector<32x32xf32>
    %cst_111 = arith.constant dense<0xFF800000> : vector<32xf32>
    %257 = vector.multi_reduction <maximumf>, %256, %cst_111 [1] : vector<32x32xf32> to vector<32xf32>
    %258 = vector.shape_cast %257 : vector<32xf32> to vector<32x1xf32>
    %259 = vector.broadcast %258 : vector<32x1xf32> to vector<32x32xf32>
    %260 = arith.subf %256, %259 : vector<32x32xf32>
    %261 = math.exp %260 : vector<32x32xf32>
    %cst_112 = arith.constant dense<0.000000e+00> : vector<32xf32>
    %262 = vector.multi_reduction <add>, %261, %cst_112 [1] : vector<32x32xf32> to vector<32xf32>
    %263 = vector.shape_cast %262 : vector<32xf32> to vector<32x1xf32>
    %264 = vector.broadcast %263 : vector<32x1xf32> to vector<32x32xf32>
    %265 = arith.divf %261, %264 : vector<32x32xf32>
    %cst_113 = arith.constant dense<0.000000e+00> : vector<32x16xf32>
    %266 = tpu.matmul %265, %252, %cst_113 {dimension_numbers = #tpu.dot_dimension_numbers<[1], [0], [0], [1], [0, 0, 1, 1], [], []>} : vector<32x32xf32>, vector<32x16xf32>, vector<32x16xf32> -> vector<32x16xf32>
    %267 = vector.extract_strided_slice %249 {offsets = [0, 16], sizes = [32, 16], strides = [1, 1]} : vector<32x96xf32> to vector<32x16xf32>
    %268 = vector.extract_strided_slice %249 {offsets = [0, 48], sizes = [32, 16], strides = [1, 1]} : vector<32x96xf32> to vector<32x16xf32>
    %269 = vector.extract_strided_slice %249 {offsets = [0, 80], sizes = [32, 16], strides = [1, 1]} : vector<32x96xf32> to vector<32x16xf32>
    %cst_114 = arith.constant dense<0.000000e+00> : vector<32x32xf32>
    %270 = tpu.matmul %267, %268, %cst_114 {dimension_numbers = #tpu.dot_dimension_numbers<[1], [1], [0], [0], [0, 0, 1, 0], [], []>} : vector<32x16xf32>, vector<32x16xf32>, vector<32x32xf32> -> vector<32x32xf32>
    %cst_115 = arith.constant 2.500000e-01 : f32
    %271 = vector.broadcast %cst_115 : f32 to vector<32x32xf32>
    %272 = arith.mulf %270, %271 : vector<32x32xf32>
    %273 = arith.addf %272, %117 : vector<32x32xf32>
    %cst_116 = arith.constant dense<0xFF800000> : vector<32xf32>
    %274 = vector.multi_reduction <maximumf>, %273, %cst_116 [1] : vector<32x32xf32> to vector<32xf32>
    %275 = vector.shape_cast %274 : vector<32xf32> to vector<32x1xf32>
    %276 = vector.broadcast %275 : vector<32x1xf32> to vector<32x32xf32>
    %277 = arith.subf %273, %276 : vector<32x32xf32>
    %278 = math.exp %277 : vector<32x32xf32>
    %cst_117 = arith.constant dense<0.000000e+00> : vector<32xf32>
    %279 = vector.multi_reduction <add>, %278, %cst_117 [1] : vector<32x32xf32> to vector<32xf32>
    %280 = vector.shape_cast %279 : vector<32xf32> to vector<32x1xf32>
    %281 = vector.broadcast %280 : vector<32x1xf32> to vector<32x32xf32>
    %282 = arith.divf %278, %281 : vector<32x32xf32>
    %cst_118 = arith.constant dense<0.000000e+00> : vector<32x16xf32>
    %283 = tpu.matmul %282, %269, %cst_118 {dimension_numbers = #tpu.dot_dimension_numbers<[1], [0], [0], [1], [0, 0, 1, 1], [], []>} : vector<32x32xf32>, vector<32x16xf32>, vector<32x16xf32> -> vector<32x16xf32>
    %284 = tpu.concatenate %266, %283 in 1 : vector<32x16xf32>, vector<32x16xf32> -> vector<32x32xf32>
    %c1_119 = arith.constant 1 : index
    %c0_120 = arith.constant 0 : index
    %c0_121 = arith.constant 0 : index
    %285 = vector.load %arg12[%c1_119, %c0_120, %c0_121] : memref<2x32x32xf32, #tpu.memory_space<vmem>>, vector<1x32x32xf32>
    %286 = vector.shape_cast %285 : vector<1x32x32xf32> to vector<32x32xf32>
    %cst_122 = arith.constant dense<0.000000e+00> : vector<32x32xf32>
    %287 = tpu.matmul %284, %286, %cst_122 {dimension_numbers = #tpu.dot_dimension_numbers<[1], [0], [0], [1], [0, 0, 1, 1], [], []>} : vector<32x32xf32>, vector<32x32xf32>, vector<32x32xf32> -> vector<32x32xf32>
    %c1_123 = arith.constant 1 : index
    %c0_124 = arith.constant 0 : index
    %c0_125 = arith.constant 0 : index
    %288 = vector.load %arg13[%c1_123, %c0_124, %c0_125] : memref<2x1x32xf32, #tpu.memory_space<vmem>>, vector<1x1x32xf32>
    %289 = vector.shape_cast %288 : vector<1x1x32xf32> to vector<1x32xf32>
    %290 = vector.broadcast %289 : vector<1x32xf32> to vector<32x32xf32>
    %291 = arith.addf %287, %290 : vector<32x32xf32>
    %292 = arith.addf %291, %242 : vector<32x32xf32>
    %c1_126 = arith.constant 1 : index
    %c0_127 = arith.constant 0 : index
    %c0_128 = arith.constant 0 : index
    %293 = vector.load %arg14[%c1_126, %c0_127, %c0_128] : memref<2x1x32xf32, #tpu.memory_space<vmem>>, vector<1x1x32xf32>
    %294 = vector.shape_cast %293 : vector<1x1x32xf32> to vector<1x32xf32>
    %c1_129 = arith.constant 1 : index
    %c0_130 = arith.constant 0 : index
    %c0_131 = arith.constant 0 : index
    %295 = vector.load %arg15[%c1_129, %c0_130, %c0_131] : memref<2x1x32xf32, #tpu.memory_space<vmem>>, vector<1x1x32xf32>
    %296 = vector.shape_cast %295 : vector<1x1x32xf32> to vector<1x32xf32>
    %cst_132 = arith.constant dense<0.000000e+00> : vector<32xf32>
    %297 = vector.multi_reduction <add>, %292, %cst_132 [1] : vector<32x32xf32> to vector<32xf32>
    %298 = vector.shape_cast %297 : vector<32xf32> to vector<32x1xf32>
    %cst_133 = arith.constant 3.200000e+01 : f32
    %299 = vector.broadcast %cst_133 : f32 to vector<32x1xf32>
    %300 = arith.divf %298, %299 : vector<32x1xf32>
    %301 = vector.broadcast %300 : vector<32x1xf32> to vector<32x32xf32>
    %302 = arith.subf %292, %301 : vector<32x32xf32>
    %303 = arith.mulf %302, %302 : vector<32x32xf32>
    %cst_134 = arith.constant dense<0.000000e+00> : vector<32xf32>
    %304 = vector.multi_reduction <add>, %303, %cst_134 [1] : vector<32x32xf32> to vector<32xf32>
    %305 = vector.shape_cast %304 : vector<32xf32> to vector<32x1xf32>
    %cst_135 = arith.constant 3.200000e+01 : f32
    %306 = vector.broadcast %cst_135 : f32 to vector<32x1xf32>
    %307 = arith.divf %305, %306 : vector<32x1xf32>
    %308 = vector.broadcast %300 : vector<32x1xf32> to vector<32x32xf32>
    %309 = arith.subf %292, %308 : vector<32x32xf32>
    %cst_136 = arith.constant 9.99999996E-13 : f32
    %310 = vector.broadcast %cst_136 : f32 to vector<32x1xf32>
    %311 = arith.addf %307, %310 : vector<32x1xf32>
    %312 = math.rsqrt %311 : vector<32x1xf32>
    %313 = vector.broadcast %312 : vector<32x1xf32> to vector<32x32xf32>
    %314 = arith.mulf %309, %313 : vector<32x32xf32>
    %315 = vector.broadcast %294 : vector<1x32xf32> to vector<32x32xf32>
    %316 = arith.mulf %314, %315 : vector<32x32xf32>
    %317 = vector.broadcast %296 : vector<1x32xf32> to vector<32x32xf32>
    %318 = arith.addf %316, %317 : vector<32x32xf32>
    %c1_137 = arith.constant 1 : index
    %c0_138 = arith.constant 0 : index
    %c0_139 = arith.constant 0 : index
    %319 = vector.load %arg16[%c1_137, %c0_138, %c0_139] : memref<2x32x64xf32, #tpu.memory_space<vmem>>, vector<1x32x64xf32>
    %320 = vector.shape_cast %319 : vector<1x32x64xf32> to vector<32x64xf32>
    %cst_140 = arith.constant dense<0.000000e+00> : vector<32x64xf32>
    %321 = tpu.matmul %318, %320, %cst_140 {dimension_numbers = #tpu.dot_dimension_numbers<[1], [0], [0], [1], [0, 0, 1, 1], [], []>} : vector<32x32xf32>, vector<32x64xf32>, vector<32x64xf32> -> vector<32x64xf32>
    %c1_141 = arith.constant 1 : index
    %c0_142 = arith.constant 0 : index
    %c0_143 = arith.constant 0 : index
    %322 = vector.load %arg17[%c1_141, %c0_142, %c0_143] : memref<2x1x64xf32, #tpu.memory_space<vmem>>, vector<1x1x64xf32>
    %323 = vector.shape_cast %322 : vector<1x1x64xf32> to vector<1x64xf32>
    %324 = vector.broadcast %323 : vector<1x64xf32> to vector<32x64xf32>
    %325 = arith.addf %321, %324 : vector<32x64xf32>
    %cst_144 = arith.constant 5.000000e-01 : f32
    %326 = vector.broadcast %cst_144 : f32 to vector<32x64xf32>
    %327 = arith.mulf %326, %325 : vector<32x64xf32>
    %cst_145 = arith.constant 0.707106769 : f32
    %328 = vector.broadcast %cst_145 : f32 to vector<32x64xf32>
    %329 = arith.mulf %325, %328 : vector<32x64xf32>
    %330 = math.erf %329 : vector<32x64xf32>
    %cst_146 = arith.constant 1.000000e+00 : f32
    %331 = vector.broadcast %cst_146 : f32 to vector<32x64xf32>
    %332 = arith.addf %331, %330 : vector<32x64xf32>
    %333 = arith.mulf %327, %332 : vector<32x64xf32>
    %c1_147 = arith.constant 1 : index
    %c0_148 = arith.constant 0 : index
    %c0_149 = arith.constant 0 : index
    %334 = vector.load %arg18[%c1_147, %c0_148, %c0_149] : memref<2x64x32xf32, #tpu.memory_space<vmem>>, vector<1x64x32xf32>
    %335 = vector.shape_cast %334 : vector<1x64x32xf32> to vector<64x32xf32>
    %cst_150 = arith.constant dense<0.000000e+00> : vector<32x32xf32>
    %336 = tpu.matmul %333, %335, %cst_150 {dimension_numbers = #tpu.dot_dimension_numbers<[1], [0], [0], [1], [0, 0, 1, 1], [], []>} : vector<32x64xf32>, vector<64x32xf32>, vector<32x32xf32> -> vector<32x32xf32>
    %c1_151 = arith.constant 1 : index
    %c0_152 = arith.constant 0 : index
    %c0_153 = arith.constant 0 : index
    %337 = vector.load %arg19[%c1_151, %c0_152, %c0_153] : memref<2x1x32xf32, #tpu.memory_space<vmem>>, vector<1x1x32xf32>
    %338 = vector.shape_cast %337 : vector<1x1x32xf32> to vector<1x32xf32>
    %339 = vector.broadcast %338 : vector<1x32xf32> to vector<32x32xf32>
    %340 = arith.addf %336, %339 : vector<32x32xf32>
    %341 = arith.addf %340, %318 : vector<32x32xf32>
    %c1_154 = arith.constant 1 : index
    %c0_155 = arith.constant 0 : index
    %c0_156 = arith.constant 0 : index
    %342 = vector.load %arg20[%c1_154, %c0_155, %c0_156] : memref<2x1x32xf32, #tpu.memory_space<vmem>>, vector<1x1x32xf32>
    %343 = vector.shape_cast %342 : vector<1x1x32xf32> to vector<1x32xf32>
    %c1_157 = arith.constant 1 : index
    %c0_158 = arith.constant 0 : index
    %c0_159 = arith.constant 0 : index
    %344 = vector.load %arg21[%c1_157, %c0_158, %c0_159] : memref<2x1x32xf32, #tpu.memory_space<vmem>>, vector<1x1x32xf32>
    %345 = vector.shape_cast %344 : vector<1x1x32xf32> to vector<1x32xf32>
    %cst_160 = arith.constant dense<0.000000e+00> : vector<32xf32>
    %346 = vector.multi_reduction <add>, %341, %cst_160 [1] : vector<32x32xf32> to vector<32xf32>
    %347 = vector.shape_cast %346 : vector<32xf32> to vector<32x1xf32>
    %cst_161 = arith.constant 3.200000e+01 : f32
    %348 = vector.broadcast %cst_161 : f32 to vector<32x1xf32>
    %349 = arith.divf %347, %348 : vector<32x1xf32>
    %350 = vector.broadcast %349 : vector<32x1xf32> to vector<32x32xf32>
    %351 = arith.subf %341, %350 : vector<32x32xf32>
    %352 = arith.mulf %351, %351 : vector<32x32xf32>
    %cst_162 = arith.constant dense<0.000000e+00> : vector<32xf32>
    %353 = vector.multi_reduction <add>, %352, %cst_162 [1] : vector<32x32xf32> to vector<32xf32>
    %354 = vector.shape_cast %353 : vector<32xf32> to vector<32x1xf32>
    %cst_163 = arith.constant 3.200000e+01 : f32
    %355 = vector.broadcast %cst_163 : f32 to vector<32x1xf32>
    %356 = arith.divf %354, %355 : vector<32x1xf32>
    %357 = vector.broadcast %349 : vector<32x1xf32> to vector<32x32xf32>
    %358 = arith.subf %341, %357 : vector<32x32xf32>
    %cst_164 = arith.constant 9.99999996E-13 : f32
    %359 = vector.broadcast %cst_164 : f32 to vector<32x1xf32>
    %360 = arith.addf %356, %359 : vector<32x1xf32>
    %361 = math.rsqrt %360 : vector<32x1xf32>
    %362 = vector.broadcast %361 : vector<32x1xf32> to vector<32x32xf32>
    %363 = arith.mulf %358, %362 : vector<32x32xf32>
    %364 = vector.broadcast %343 : vector<1x32xf32> to vector<32x32xf32>
    %365 = arith.mulf %363, %364 : vector<32x32xf32>
    %366 = vector.broadcast %345 : vector<1x32xf32> to vector<32x32xf32>
    %367 = arith.addf %365, %366 : vector<32x32xf32>
    %368 = vector.extract_strided_slice %367 {offsets = [0, 0], sizes = [1, 32], strides = [1, 1]} : vector<32x32xf32> to vector<1x32xf32>
    %369 = vector.extract_strided_slice %367 {offsets = [16, 0], sizes = [1, 32], strides = [1, 1]} : vector<32x32xf32> to vector<1x32xf32>
    %370 = tpu.concatenate %368, %369 in 0 : vector<1x32xf32>, vector<1x32xf32> -> vector<2x32xf32>
    %c0_165 = arith.constant 0 : index
    %c0_166 = arith.constant 0 : index
    %371 = vector.load %arg22[%c0_165, %c0_166] : memref<32x32xf32, #tpu.memory_space<vmem>>, vector<32x32xf32>
    %cst_167 = arith.constant dense<0.000000e+00> : vector<2x32xf32>
    %372 = tpu.matmul %370, %371, %cst_167 {dimension_numbers = #tpu.dot_dimension_numbers<[1], [0], [0], [1], [0, 0, 1, 1], [], []>} : vector<2x32xf32>, vector<32x32xf32>, vector<2x32xf32> -> vector<2x32xf32>
    %c0_168 = arith.constant 0 : index
    %c0_169 = arith.constant 0 : index
    %373 = vector.load %arg23[%c0_168, %c0_169] : memref<1x32xf32, #tpu.memory_space<vmem>>, vector<1x32xf32>
    %374 = vector.broadcast %373 : vector<1x32xf32> to vector<2x32xf32>
    %375 = arith.addf %372, %374 : vector<2x32xf32>
    %376 = math.tanh %375 : vector<2x32xf32>
    %c0_170 = arith.constant 0 : index
    %c0_171 = arith.constant 0 : index
    %377 = vector.load %arg24[%c0_170, %c0_171] : memref<32x3xf32, #tpu.memory_space<vmem>>, vector<32x3xf32>
    %cst_172 = arith.constant dense<0.000000e+00> : vector<2x3xf32>
    %378 = tpu.matmul %376, %377, %cst_172 {dimension_numbers = #tpu.dot_dimension_numbers<[1], [0], [0], [1], [0, 0, 1, 1], [], []>} : vector<2x32xf32>, vector<32x3xf32>, vector<2x3xf32> -> vector<2x3xf32>
    %c0_173 = arith.constant 0 : index
    %c0_174 = arith.constant 0 : index
    %379 = vector.load %arg25[%c0_173, %c0_174] : memref<1x3xf32, #tpu.memory_space<vmem>>, vector<1x3xf32>
    %380 = vector.broadcast %379 : vector<1x3xf32> to vector<2x3xf32>
    %381 = arith.addf %378, %380 : vector<2x3xf32>
    %cst_175 = arith.constant dense<0xFF800000> : vector<2xf32>
    %382 = vector.multi_reduction <maximumf>, %381, %cst_175 [1] : vector<2x3xf32> to vector<2xf32>
    %383 = vector.shape_cast %382 : vector<2xf32> to vector<2x1xf32>
    %384 = vector.broadcast %383 : vector<2x1xf32> to vector<2x3xf32>
    %385 = arith.subf %381, %384 : vector<2x3xf32>
    %386 = math.exp %385 : vector<2x3xf32>
    %cst_176 = arith.constant dense<0.000000e+00> : vector<2xf32>
    %387 = vector.multi_reduction <add>, %386, %cst_176 [1] : vector<2x3xf32> to vector<2xf32>
    %388 = vector.shape_cast %387 : vector<2xf32> to vector<2x1xf32>
    %389 = math.log %388 : vector<2x1xf32>
    %390 = arith.addf %389, %383 : vector<2x1xf32>
    %391 = vector.broadcast %390 : vector<2x1xf32> to vector<2x3xf32>
    %392 = arith.subf %381, %391 : vector<2x3xf32>
    %393 = tpu.iota {dimensions = array<i32: 1>} : vector<2x3xi32>
    %c0_177 = arith.constant 0 : index
    %c0_178 = arith.constant 0 : index
    %394 = vector.load %arg3[%c0_177, %c0_178] : memref<2x1xi32, #tpu.memory_space<vmem>>, vector<2x1xi32>
    %395 = vector.broadcast %394 : vector<2x1xi32> to vector<2x3xi32>
    %396 = arith.cmpi eq, %393, %395 : vector<2x3xi32>
    %397 = arith.extui %396 : vector<2x3xi1> to vector<2x3xi32>
    %398 = arith.sitofp %397 : vector<2x3xi32> to vector<2x3xf32>
    %399 = arith.mulf %398, %392 : vector<2x3xf32>
    %cst_179 = arith.constant dense<0.000000e+00> : vector<2xf32>
    %400 = vector.multi_reduction <add>, %399, %cst_179 [1] : vector<2x3xf32> to vector<2xf32>
    %401 = vector.shape_cast %400 : vector<2xf32> to vector<2x1xf32>
    %cst_180 = arith.constant 0.000000e+00 : f32
    %402 = vector.broadcast %cst_180 : f32 to vector<2x1xf32>
    %403 = arith.subf %402, %401 : vector<2x1xf32>
    %cst_181 = arith.constant dense<0.000000e+00> : vector<1xf32>
    %404 = vector.multi_reduction <add>, %403, %cst_181 [0] : vector<2x1xf32> to vector<1xf32>
    %405 = vector.shape_cast %404 : vector<1xf32> to vector<1x1xf32>
    %cst_182 = arith.constant 5.000000e-01 : f32
    %406 = vector.broadcast %cst_182 : f32 to vector<1x1xf32>
    %407 = arith.mulf %405, %406 : vector<1x1xf32>
    %cst_183 = arith.constant 0.000000e+00 : f32
    %408 = vector.broadcast %cst_183 : f32 to vector<2x125xf32>
    %409 = tpu.concatenate %381, %408 in 1 : vector<2x3xf32>, vector<2x125xf32> -> vector<2x128xf32>
    %cst_184 = arith.constant 0.000000e+00 : f32
    %410 = vector.broadcast %cst_184 : f32 to vector<1x127xf32>
    %411 = tpu.concatenate %407, %410 in 1 : vector<1x1xf32>, vector<1x127xf32> -> vector<1x128xf32>
    %cst_185 = arith.constant 0.000000e+00 : f32
    %412 = vector.broadcast %cst_185 : f32 to vector<5x128xf32>
    %413 = tpu.concatenate %409, %411, %412 in 0 : vector<2x128xf32>, vector<1x128xf32>, vector<5x128xf32> -> vector<8x128xf32>
    %c0_186 = arith.constant 0 : index
    %c0_187 = arith.constant 0 : index
    %414 = vector.load %arg26[%c0_186, %c0_187] : memref<8x128xf32, #tpu.memory_space<vmem>>, vector<8x128xf32>
    tpu.vector_store %arg26[%c0_186, %c0_187], %413 {strides = array<i32>} : memref<8x128xf32, #tpu.memory_space<vmem>>, vector<8x128xf32>,
    return
  }
}

</mosaic_0001>

<bundles_post_ra>
// kernel: forward.1
= control target key start
LH: loop header
LB: loop body
LE: loop exit
PB: predicated region body
PF: predicated region fallthrough
CT: control target
= control target key end

     0   :  { %v3949_v0 = vmov 0   ;;  %vm118_vm0 = vcmask 1041408   ;;  %v90_v13 = vlaneseq  ;;  %vm111_vm1 = vcmask 408576   ;;  %s3953_s27 = smov 20   ;;  %s3957_s28 = smov 80   ;;  %s4792_s0 = inlined_call_operand.vmem [shape: s32[16,1], index: 0, kind: input, shape index: {}]   ;;  %s4793_s4 = inlined_call_operand.vmem [shape: f32[50,32], index: 4, kind: input, shape index: {}]   ;;  %s4794_s6 = inlined_call_operand.vmem [shape: f32[2,32], index: 6, kind: input, shape index: {}]   ;;  %s4795_s5 = inlined_call_operand.vmem [shape: f32[64,32], index: 5, kind: input, shape index: {}]   ;;  %s4796_s1 = inlined_call_operand.vmem [shape: s32[16,1], index: 1, kind: input, shape index: {}]   ;;  %s4797_s7 = inlined_call_operand.vmem [shape: f32[1,32], index: 7, kind: input, shape index: {}]   ;;  %s4798_s8 = inlined_call_operand.vmem [shape: f32[1,32], index: 8, kind: input, shape index: {}]   ;;  %s4799_s9 = inlined_call_operand.vmem [shape: f32[4,32], index: 9, kind: input, shape index: {}]   ;;  %s4800_s10 = inlined_call_operand.vmem [shape: f32[2,32,96], index: 10, kind: input, shape index: {}]   ;;  %s4801_s11 = inlined_call_operand.vmem [shape: f32[2,1,96], index: 11, kind: input, shape index: {}]   ;;  %s4802_s2 = inlined_call_operand.vmem [shape: f32[2,8], index: 2, kind: input, shape index: {}]   ;;  %s4803_s12 = inlined_call_operand.vmem [shape: f32[2,32,32], index: 12, kind: input, shape index: {}]   ;;  %s4804_s13 = inlined_call_operand.vmem [shape: f32[2,1,32], index: 13, kind: input, shape index: {}]   ;;  %s4805_s16 = inlined_call_operand.vmem [shape: f32[2,32,64], index: 16, kind: input, shape index: {}]   ;;  %s4806_s14 = inlined_call_operand.vmem [shape: f32[2,1,32], index: 14, kind: input, shape index: {}]   ;;  %s4807_s15 = inlined_call_operand.vmem [shape: f32[2,1,32], index: 15, kind: input, shape index: {}]   ;;  %s4808_s18 = inlined_call_operand.vmem [shape: f32[2,64,32], index: 18, kind: input, shape index: {}]   ;;  %s4809_s17 = inlined_call_operand.vmem [shape: f32[2,1,64], index: 17, kind: input, shape index: {}]   ;;  %s4810_s19 = inlined_call_operand.vmem [shape: f32[2,1,32], index: 19, kind: input, shape index: {}]   ;;  %s4811_s20 = inlined_call_operand.vmem [shape: f32[2,1,32], index: 20, kind: input, shape index: {}]   ;;  %s4812_s21 = inlined_call_operand.vmem [shape: f32[2,1,32], index: 21, kind: input, shape index: {}]   ;;  %s4813_s22 = inlined_call_operand.vmem [shape: f32[32,32], index: 22, kind: input, shape index: {}]   ;;  %s4814_s24 = inlined_call_operand.vmem [shape: f32[32,3], index: 24, kind: input, shape index: {}]   ;;  %s4815_s23 = inlined_call_operand.vmem [shape: f32[1,32], index: 23, kind: input, shape index: {}]   ;;  %s4816_s25 = inlined_call_operand.vmem [shape: f32[1,3], index: 25, kind: input, shape index: {}]   ;;  %s4817_s3 = inlined_call_operand.vmem [shape: s32[2,1], index: 3, kind: input, shape index: {}]   ;;  %s4818_s26 = inlined_call_operand.vmem [shape: f32[8,128], index: 26, kind: output, shape index: {}]  }
   0x1   :  { %4827 = sst [smem:[#allocation2_spill]] %s4792_s0  ;;  %3741 = vset.pattern.permute.xlu0 %v3949_v0  ;;  %3742 = vset.pattern.permute.xlu1 %v3949_v0  ;;  %v3950_v16 = vmov 0.0   ;;  %vm205_vm4 = vcmask 261120   ;;  %vm282_vm5 = vcmask 1043456   ;;  %vm368_vm6 = vcmask 130048   ;;  %s3959_s29 = smov 48  }
   0x2   :  { %4828 = sst [smem:[#allocation3_spill]] %s4793_s4  ;;  %v4127_v14 = vand.u32 127, %v90_v13  ;;  %v200_v20 = vshrl.u32 %v90_v13, 7  ;;  %vm4260_vm7 = vmpackc.low %vm368_vm6, %vm368_vm6  ;;  %vm364_vm8 = vcmask 31744   ;;  %vm366_vm9 = vcmask 97280  }
   0x3   :  { %4829 = sst [smem:[#allocation4_spill]] %s4794_s6  ;;  %vm370_vm10 = vcmask 162816   ;;  %vm372_vm11 = vcmask 228352   ;;  %vm1410_vm14 = vcmask 523264   ;;  %vm3962_vm15 = vmmov 0  }
   0x4   :  { %4830 = sst [smem:[#allocation5_spill]] %s4795_s5  ;;  %v4133_v21 = vsub.s32 0, %v200_v20  ;;  %s4840_s0 = sld [smem:[#allocation4_spill]]  ;;  %v269_v55 = vsub.s32 1, %v200_v20 }
   0x5   :  { %4831 = sst [smem:[#allocation6_spill]] %s4796_s1  ;;  %s4839_s1 = sld [smem:[#allocation3_spill]] }
   0x6   :  { %4832 = sst [smem:[#allocation7_spill]] %s4797_s7  ;;  %s3956_s5 = smov 64  }
   0x7   :  { %4833 = sst [smem:[#allocation8_spill]] %s4798_s8  ;;  %s4842_s8 = sld [smem:[#allocation6_spill]] }
   0x8   :  { %4834 = sst [smem:[#allocation9_spill]] %s4799_s9  ;;  %s4838_s9 = sld [smem:[#allocation2_spill]] }
   0x9   :  { %4835 = sst [smem:[#allocation10_spill]] %s4800_s10  ;;  %s4843_s10 = sld [smem:[#allocation7_spill]] }
   0xa   :  { %4836 = sst [smem:[#allocation11_spill]] %s4801_s11  ;;  %v87_v22 = vld [vmem:[%s4840_s0] sm:$0x3]  ;;  %s4845_s30 = sld [smem:[#allocation9_spill]] }
   0xb   :  { %4837 = sst [smem:[#allocation12_spill]] %s4802_s2  ;;  %v104_v2 = vld [vmem:[%s4839_s1] sm:$0xff]  ;;  %v105_v3 = vld [vmem:[%s4839_s1 + $0x8] sm:$0xff]  ;;  %v106_v4 = vld [vmem:[%s4839_s1 + $0x10] sm:$0xff]  ;;  %s4841_s2 = sld [smem:[#allocation5_spill]]  ;;  %v4144_v24 = vrot.slane %v87_v22, %v4133_v21  ;;  %v254_v52 = vrot.slane %v87_v22, 7 }
   0xc   :  { %v107_v5 = vld [vmem:[%s4839_s1 + $0x18] sm:$0xff]  ;;  %v3543_v7 = vpack.c.bf16 %v105_v3, %v104_v2  ;;  %v108_v9 = vld [vmem:[%s4839_s1 + $0x20] sm:$0xff]  ;;  %v109_v10 = vld [vmem:[%s4839_s1 + $0x28] sm:$0xff]  ;;  %s4846_s4 = sld [smem:[#allocation10_spill]]  ;;  %s4847_s11 = sld [smem:[#allocation11_spill]] }
   0xd   :  { %v3547_v8 = vpack.c.bf16 %v107_v5, %v106_v4  ;;  %v3551_v11 = vpack.c.bf16 %v109_v10, %v108_v9  ;;  %v110_v12 = vld [vmem:[%s4839_s1 + $0x30] sm:$0x3]  ;;  %v249_v43 = vld [vmem:[%s4842_s8] sm:$0xff]  ;;  %v250_v45 = vld [vmem:[%s4842_s8 + $0x8] sm:$0xff]  ;;  %v256_v54 = vsub.f32 %v87_v22, %v254_v52  ;;  %s4844_s1 = sld [smem:[#allocation8_spill]]  ;;  %s3952_s8 = smov 4  }
   0xe   :  { %v88_v1 = vld [vmem:[%s4838_s9] sm:$0xff]  ;;  %v89_v6 = vld [vmem:[%s4838_s9 + $0x8] sm:$0xff]  ;;  %3544 = vmatprep.subr.bf16.mxu0 %v3543_v7  ;;  %v251_v44 = vcvt.s32.f32 %v249_v43  ;;  %v252_v46 = vcvt.s32.f32 %v250_v45  ;;  %s4825_s9 = smov 16   ;;  %s4851_s0 = smov 16  }
   0xf   :  { %93 = vperm.xlu0 %3741, %v88_v1   ;;  %3546 = vmatpush3.bf16.msra.mxu0 %v3543_v7  ;;  %v270_v56 = vrot.slane %v256_v54, %v269_v55  ;;  %v4163_v58 = vld [vmem:[%s4843_s10] ss:$0 sm:$0xff]  ;;  %s3958_s10 = smov 112  }
  0x10   :  { %3548 = vmatprep.subr.bf16.mxu0 %v3547_v8 }
  0x11   :  { %v4141_v23 = vld [vmem:[%s4841_s2] sm:$0xff]  ;;  %v86_v10 = vld [vmem:[%s4841_s2 + $0x8] sm:$0xff]  ;;  %s4848_s2 = sld [smem:[#allocation12_spill]] }
  0x12   :  { %v401_v52 = vld [vmem:[%s4846_s4] sm:$0xff]  ;;  %v403_v55 = vld [vmem:[%s4846_s4 + $0x10] sm:$0xff] }
  0x13   :  { %96 = vperm.xlu0 %3741, %v89_v6   ;;  %3550 = vmatpush3.bf16.msra.mxu0 %v3547_v8  ;;  %v4168_v61 = vld [vmem:[%s4844_s1] ss:$0 sm:$0xff] }
  0x14   :  { %3552 = vmatprep.subr.bf16.mxu0 %v3551_v11  ;;  %v275_v6 = vld [vmem:[%s4845_s30] sm:$0xf]  ;;  %s3951_s30 = smov 96  }
  0x17   :  { %3554 = vmatpush3.bf16.msra.mxu0 %v3551_v11 }
  0x18   :  { %3276 = vmatprep.subr.msk.mxu0 %vm118_vm0, %v110_v12 }
  0x1b   :  { %3277 = vmatpush3.msk.msra.mxu0 %vm118_vm0, %v110_v12 }
  0x8e   :  { %v94_v15 = vpop.permute.xlu0 %93 }
  0x8f   :  { %vm98_vm2 = vcmp.eq.s32.totalorder %v4127_v14, %v94_v15 }
  0x90   :  { %v2971_v17 = vsel %vm98_vm2, 1.0, %v3950_v16  ;;  %vm2922_vm2 = vcmask 17408  }
  0x91   :  { %3278 = vmatprep.mubr.msk.f32.mxu0 %vm111_vm1, %v2971_v17 }
  0x92   :  { %v97_v18 = vpop.permute.xlu0 %96 }
  0x93   :  { %vm99_vm3 = vcmp.eq.s32.totalorder %v4127_v14, %v97_v18 }
  0x94   :  { %v2972_v19 = vsel %vm99_vm3, 1.0, %v3950_v16 }
  0x95   :  { %3279 = vmatmul.mubr.msk.f32.vlgmr.msra.gmra.mrb[0].mxu0 %vm111_vm1, %v2972_v19  ;;  %vm2751_vm1 = vcmask 1040384  }
 0x168   :  { %v3280_v25 = vpop.f32.mrb[0].mxu0 }
 0x169   :  { %v188_v26 = vpop.f32.mrb[1].mxu0  ;;  %v198_v27 = vadd.f32 %v3280_v25, %v4141_v23 }
 0x16a   :  { %v197_v28 = vadd.f32 %v188_v26, %v4141_v23 }
 0x16b   :  { %v204_v31 = vadd.f32 %v4144_v24, %v198_v27 }
 0x16c   :  { %v203_v29 = vadd.f32 %v4144_v24, %v197_v28 }
 0x16d   :  { %v209_v32 = vsel %vm205_vm4, %v204_v31, 0.0 }
 0x16e   :  { %v206_v30 = vsel %vm205_vm4, %v203_v29, 0.0 }
 0x16f   :  { %207 = vadd.xlane.f32.xlu1 %v206_v30 }
 0x173   :  { %210 = vadd.xlane.f32.xlu1 %v209_v32 }
 0x1fc   :  { %v208_v33 = vpop.xlane.xlu1 %207 }
 0x1fd   :  { %v213_v34 = vmul.f32 0.03125, %v208_v33 }
 0x1ff   :  { %v215_v35 = vsub.f32 %v203_v29, %v213_v34 }
 0x200   :  { %v211_v36 = vpop.xlane.xlu1 %210 }
 0x201   :  { %v214_v37 = vmul.f32 0.03125, %v211_v36  ;;  %v217_v38 = vmul.f32 %v215_v35, %v215_v35 }
 0x203   :  { %v216_v39 = vsub.f32 %v204_v31, %v214_v37  ;;  %v219_v40 = vsel %vm205_vm4, %v217_v38, 0.0 }
 0x204   :  { %220 = vadd.xlane.f32.xlu0 %v219_v40 }
 0x205   :  { %v218_v41 = vmul.f32 %v216_v39, %v216_v39 }
 0x207   :  { %v222_v42 = vsel %vm205_vm4, %v218_v41, 0.0 }
 0x208   :  { %223 = vadd.xlane.f32.xlu1 %v222_v42 }
 0x219   :  { %259 = vperm.xlu1 %3742, %v251_v44  }
 0x21d   :  { %264 = vperm.xlu1 %3742, %v252_v46  }
 0x291   :  { %v221_v47 = vpop.xlane.xlu0 %220 }
 0x292   :  { %v225_v48 = vmul.f32 0.03125, %v221_v47 }
 0x294   :  { %v227_v49 = vadd.f32 1e-12, %v225_v48 }
 0x295   :  { %v224_v50 = vpop.xlane.xlu1 %223 }
 0x296   :  { %3823 = vrsqrt.f32 %v227_v49  ;;  %v226_v51 = vmul.f32 0.03125, %v224_v50 }
 0x298   :  { %v228_v53 = vadd.f32 1e-12, %v226_v51 }
 0x299   :  { %v260_v59 = vpop.permute.xlu1 %259 }
 0x29a   :  { %3825 = vrsqrt.f32 %v228_v53  ;;  %v271_v63 = vmul.f32 %v270_v56, %v260_v59  ;;  %v402_v53 = vld [vmem:[%s4846_s4 + $0x8] sm:$0xff] }
 0x29b   :  { %v3555_v54 = vpack.c.bf16 %v402_v53, %v401_v52 }
 0x29d   :  { %v265_v3 = vpop.permute.xlu1 %264  ;;  %3556 = vmatprep.subr.bf16.mxu1 %v3555_v54 }
 0x29e   :  { %v272_v9 = vmul.f32 %v270_v56, %v265_v3  ;;  %v404_v56 = vld [vmem:[%s4846_s4 + $0x18] sm:$0xff]  ;;  %3558 = vmatpush3.bf16.msra.mxu1 %v3555_v54  ;;  %v3954_v54 = vmov 1.0  }
 0x2a0   :  { %v3824_v57 = vpop.eup %3823 }
 0x2a1   :  { %v231_v60 = vmul.f32 %v3824_v57, %v215_v35  ;;  %v3559_v57 = vpack.c.bf16 %v404_v56, %v403_v55  ;;  %v376_v55 = vsel %vm368_vm6, 0.0, %v3954_v54 }
 0x2a3   :  { %v239_v62 = vmul.f32 %v4163_v58, %v231_v60  ;;  %3560 = vmatprep.subr.bf16.mxu1 %v3559_v57 }
 0x2a4   :  { %v3826_v0 = vpop.eup %3825  ;;  %3562 = vmatpush3.bf16.msra.mxu1 %v3559_v57  ;;  %v390_v57 = vrot.slane %v376_v55, %v4133_v21 }
 0x2a5   :  { %v247_v1 = vadd.f32 %v4168_v61, %v239_v62  ;;  %v232_v2 = vmul.f32 %v3826_v0, %v216_v39 }
 0x2a6   :  { %vm2978_vm12 = vcmp.eq.f32.partialorder %v390_v57, 0.0  ;;  %vm2979_vm13 = vcmp.eq.f32.partialorder %v390_v57, 1.0 }
 0x2a7   :  { %v273_v4 = vadd.f32 %v271_v63, %v247_v1  ;;  %v240_v5 = vmul.f32 %v4163_v58, %v232_v2 }
 0x2a9   :  { %v278_v7 = vrot.slane %v273_v4, 4  ;;  %v248_v8 = vadd.f32 %v4168_v61, %v240_v5 }
 0x2ab   :  { %v274_v11 = vadd.f32 %v272_v9, %v248_v8  ;;  %v285_v12 = vsel %vm282_vm5, %v278_v7, 0.0  ;;  %v283_v13 = vsel %vm282_vm5, %v275_v6, %v278_v7 }
 0x2ac   :  { %v288_v15 = vadd.f32 %v285_v12, %v86_v10  ;;  %v287_v17 = vadd.f32 %v283_v13, %v4141_v23 }
 0x2ad   :  { %v279_v18 = vrot.slane %v274_v11, 4 }
 0x2ae   :  { %v292_v19 = vadd.f32 %v288_v15, %v4144_v24  ;;  %v291_v20 = vadd.f32 %v287_v17, %v4144_v24 }
 0x2af   :  { %v284_v22 = vsel %vm282_vm5, %v275_v6, %v279_v18  ;;  %v286_v25 = vsel %vm282_vm5, %v279_v18, 0.0  ;;  %vm2956_vm5 = vcmask 23552  }
 0x2b0   :  { %v298_v26 = vsel %vm205_vm4, %v292_v19, 0.0  ;;  %v295_v27 = vsel %vm205_vm4, %v291_v20, 0.0  ;;  %v289_v28 = vadd.f32 %v284_v22, %v4141_v23  ;;  %v290_v29 = vadd.f32 %v286_v25, %v86_v10 }
 0x2b1   :  { %299 = vadd.xlane.f32.xlu0 %v298_v26  ;;  %296 = vadd.xlane.f32.xlu1 %v295_v27 }
 0x2b2   :  { %v293_v30 = vadd.f32 %v289_v28, %v4144_v24  ;;  %v294_v32 = vadd.f32 %v290_v29, %v4144_v24  ;;  %v2980_v29 = vld [vmem:[%s4847_s11] ss:$0 sm:$0xff] }
 0x2b4   :  { %v301_v31 = vsel %vm205_vm4, %v293_v30, 0.0  ;;  %v304_v33 = vsel %vm205_vm4, %v294_v32, 0.0 }
 0x2b5   :  { %302 = vadd.xlane.f32.xlu0 %v301_v31 }
 0x2b9   :  { %305 = vadd.xlane.f32.xlu0 %v304_v33 }
 0x33e   :  { %v300_v34 = vpop.xlane.xlu0 %299  ;;  %v297_v35 = vpop.xlane.xlu1 %296 }
 0x33f   :  { %v308_v36 = vmul.f32 0.03125, %v300_v34  ;;  %v307_v37 = vmul.f32 0.03125, %v297_v35 }
 0x341   :  { %v312_v38 = vsub.f32 %v292_v19, %v308_v36  ;;  %v311_v39 = vsub.f32 %v291_v20, %v307_v37 }
 0x342   :  { %v303_v23 = vpop.xlane.xlu0 %302 }
 0x343   :  { %v309_v40 = vmul.f32 0.03125, %v303_v23  ;;  %v315_v41 = vmul.f32 %v311_v39, %v311_v39  ;;  %v316_v44 = vmul.f32 %v312_v38, %v312_v38 }
 0x345   :  { %v313_v42 = vsub.f32 %v293_v30, %v309_v40  ;;  %v319_v43 = vsel %vm205_vm4, %v315_v41, 0.0  ;;  %v322_v47 = vsel %vm205_vm4, %v316_v44, 0.0 }
 0x346   :  { %v306_v45 = vpop.xlane.xlu0 %305  ;;  %320 = vadd.xlane.f32.xlu0 %v319_v43 }
 0x347   :  { %v310_v24 = vmul.f32 0.03125, %v306_v45  ;;  %v317_v48 = vmul.f32 %v313_v42, %v313_v42 }
 0x349   :  { %v314_v46 = vsub.f32 %v294_v32, %v310_v24  ;;  %v325_v49 = vsel %vm205_vm4, %v317_v48, 0.0 }
 0x34a   :  { %323 = vadd.xlane.f32.xlu0 %v322_v47 }
 0x34b   :  { %v318_v50 = vmul.f32 %v314_v46, %v314_v46 }
 0x34d   :  { %v328_v51 = vsel %vm205_vm4, %v318_v50, 0.0 }
 0x34e   :  { %326 = vadd.xlane.f32.xlu0 %v325_v49 }
 0x352   :  { %329 = vadd.xlane.f32.xlu0 %v328_v51 }
 0x3d3   :  { %v321_v59 = vpop.xlane.xlu0 %320 }
 0x3d4   :  { %v331_v60 = vmul.f32 0.03125, %v321_v59 }
 0x3d6   :  { %v335_v62 = vadd.f32 1e-12, %v331_v60 }
 0x3d7   :  { %v324_v63 = vpop.xlane.xlu0 %323 }
 0x3d8   :  { %3827 = vrsqrt.f32 %v335_v62  ;;  %v332_v0 = vmul.f32 0.03125, %v324_v63  ;;  %v3955_v62 = vmov -1e+09  }
 0x3d9   :  { %v393_v63 = vsel %vm2978_vm12, 0.0, %v3955_v62 }
 0x3da   :  { %v336_v1 = vadd.f32 1e-12, %v332_v0 }
 0x3db   :  { %v327_v2 = vpop.xlane.xlu0 %326 }
 0x3dc   :  { %3829 = vrsqrt.f32 %v336_v1  ;;  %v333_v3 = vmul.f32 0.03125, %v327_v2 }
 0x3de   :  { %v337_v4 = vadd.f32 1e-12, %v333_v3 }
 0x3df   :  { %v330_v5 = vpop.xlane.xlu0 %329 }
 0x3e0   :  { %3831 = vrsqrt.f32 %v337_v4  ;;  %v334_v6 = vmul.f32 0.03125, %v330_v5  ;;  %v394_v4 = vsel %vm2979_vm13, 0.0, %v3955_v62 }
 0x3e2   :  { %v3828_v7 = vpop.eup %3827  ;;  %v338_v8 = vadd.f32 1e-12, %v334_v6 }
 0x3e3   :  { %v343_v9 = vmul.f32 %v3828_v7, %v311_v39 }
 0x3e4   :  { %3833 = vrsqrt.f32 %v338_v8 }
 0x3e5   :  { %v347_v10 = vmul.f32 %v4163_v58, %v343_v9 }
 0x3e6   :  { %v3830_v11 = vpop.eup %3829 }
 0x3e7   :  { %v4208_v12 = vadd.f32 %v4168_v61, %v347_v10  ;;  %v344_v13 = vmul.f32 %v3830_v11, %v312_v38  ;;  %v355_v38 = vld [vmem:[%s4848_s2] sm:$0x3] }
 0x3e8   :  { %v360_v39 = vrot.slane %v355_v38, 1 }
 0x3e9   :  { %3289 = vmatprep.mubr.msk.f32.mxu1 %vm205_vm4, %v4208_v12  ;;  %v348_v15 = vmul.f32 %v4163_v58, %v344_v13 }
 0x3ea   :  { %v3832_v17 = vpop.eup %3831 }
 0x3eb   :  { %v4214_v18 = vadd.f32 %v4168_v61, %v348_v15  ;;  %v345_v19 = vmul.f32 %v3832_v17, %v313_v42 }
 0x3ed   :  { %3290 = vmatmul.mubr.msk.f32.vlgmr.msra.gmra.mrb[0].mxu1 %vm205_vm4, %v4214_v18  ;;  %v349_v20 = vmul.f32 %v4163_v58, %v345_v19 }
 0x3ee   :  { %v3834_v22 = vpop.eup %3833 }
 0x3ef   :  { %v4220_v25 = vadd.f32 %v4168_v61, %v349_v20  ;;  %v346_v26 = vmul.f32 %v3834_v22, %v314_v46 }
 0x3f1   :  { %3292 = vmatprep.mubr.msk.f32.mxu1 %vm205_vm4, %v4220_v25  ;;  %v350_v27 = vmul.f32 %v4163_v58, %v346_v26 }
 0x3f3   :  { %v4226_v28 = vadd.f32 %v4168_v61, %v350_v27 }
 0x3f5   :  { %3293 = vmatmul.mubr.msk.f32.gmra.mrb[2].mxu1 %vm205_vm4, %v4226_v28 }
 0x4c0   :  { %v3291_v30 = vpop.f32.mrb[0].mxu1 }
 0x4c1   :  { %v4233_v31 = vadd.f32 %v3291_v30, %v2980_v29  ;;  %v490_v32 = vpop.f32.mrb[1].mxu1 }
 0x4c2   :  { %v4235_v33 = vadd.f32 %v2980_v29, %v490_v32 }
 0x4c4   :  { %3303 = vmatprep.mubr.msk.f32.mxu1 %vm368_vm6, %v4235_v33  ;;  %v4241_v58 = vpack.i.bf16 %v4233_v31, %v4235_v33 }
 0x4c6   :  { %3744 = vrot.lane.b32.xlu0 %v4241_v58, %s3951_s30 }
 0x4c8   :  { %v3294_v61 = vpop.f32.mrb[2].mxu1 }
 0x4c9   :  { %v4245_v34 = vadd.f32 %v3294_v61, %v2980_v29  ;;  %v500_v35 = vpop.f32.mrb[3].mxu1 }
 0x4ca   :  { %v4247_v36 = vadd.f32 %v2980_v29, %v500_v35  ;;  %361 = vrot.lane.b32.xlu0 %v360_v39, %s3953_s27 }
 0x4cc   :  { %v4251_v37 = vpack.i.bf16 %v4245_v34, %v4247_v36 }
 0x4ce   :  { %3749 = vrot.lane.b32.xlu1 %v4251_v37, %s3951_s30 }
 0x4d2   :  { %357 = vrot.lane.b32.xlu1 %v355_v38, %s3952_s8 }
 0x538   :  { %v3745_v23 = vpop.permute.xlu0 %3744 }
 0x539   :  { %v3747_v40 = vunpack.i.h.bf16 %v3745_v23  ;;  %v3746_v41 = vunpack.i.l.bf16 %v3745_v23 }
 0x53b   :  { %v3563_v43 = vpack.c.bf16 %v3747_v40, %v3746_v41 }
 0x53c   :  { %v362_v51 = vpop.permute.xlu0 %361 }
 0x53d   :  { %3565 = vmatprep.subr.msk.bf16.mxu1 %vm4260_vm7, %v3563_v43 }
 0x53e   :  { %3568 = vmatpush3.bf16.xpose.msk.msra.mxu1 %vm4260_vm7, %v3563_v43 }
 0x540   :  { %v3750_v44 = vpop.permute.xlu1 %3749 }
 0x541   :  { %v3752_v45 = vunpack.i.h.bf16 %v3750_v44  ;;  %v3751_v24 = vunpack.i.l.bf16 %v3750_v44 }
 0x543   :  { %v3569_v46 = vpack.c.bf16 %v3752_v45, %v3751_v24 }
 0x544   :  { %v358_v47 = vpop.permute.xlu1 %357 }
 0x545   :  { %3571 = vmatprep.subr.msk.bf16.mxu1 %vm4260_vm7, %v3569_v46  ;;  %v365_v48 = vsel %vm364_vm8, 1.0, %v358_v47 }
 0x546   :  { %3574 = vmatpush3.bf16.xpose.msk.msra.mxu1 %vm4260_vm7, %v3569_v46  ;;  %v367_v49 = vsel %vm366_vm9, %v365_v48, 0.0 }
 0x547   :  { %v369_v50 = vsel %vm368_vm6, %v367_v49, 1.0 }
 0x548   :  { %v371_v52 = vsel %vm370_vm10, %v369_v50, %v362_v51 }
 0x549   :  { %v373_v53 = vsel %vm372_vm11, %v371_v52, 0.0 }
 0x54a   :  { %v374_v56 = vsub.f32 1.0, %v373_v53 }
 0x54c   :  { %v375_v59 = vmul.f32 -1e+09, %v374_v56 }
 0x54d   :  { %3304 = vmatmul.mubr.msk.f32.vlgmr.msra.gmra.mrb[4].mxu1 %vm368_vm6, %v4233_v31 }
 0x54e   :  { %3306 = vmatprep.mubr.msk.f32.mxu1 %vm368_vm6, %v4247_v36  ;;  %v398_v60 = vrot.slane %v375_v59, %v4133_v21 }
 0x550   :  { %v4282_v0 = vadd.f32 %v398_v60, %v393_v63  ;;  %v4286_v9 = vadd.f32 %v398_v60, %v394_v4 }
 0x551   :  { %3307 = vmatmul.mubr.msk.f32.gmra.mrb[6].mxu1 %vm368_vm6, %v4245_v34 }
 0x620   :  { %v3305_v1 = vpop.f32.mrb[4].mxu1 }
 0x621   :  { %v623_v2 = vmul.f32 0.25, %v3305_v1  ;;  %v603_v3 = vpop.f32.mrb[5].mxu1 }
 0x622   :  { %v622_v5 = vmul.f32 0.25, %v603_v3 }
 0x623   :  { %v627_v6 = vadd.f32 %v623_v2, %v4282_v0 }
 0x624   :  { %v3308_v7 = vpop.f32.mrb[6].mxu1  ;;  %v626_v8 = vadd.f32 %v622_v5, %v4282_v0 }
 0x625   :  { %v625_v10 = vmul.f32 0.25, %v3308_v7  ;;  %v613_v11 = vpop.f32.mrb[7].mxu1  ;;  %v633_v21 = vsel %vm205_vm4, %v627_v6, -inf }
 0x626   :  { %v624_v13 = vmul.f32 0.25, %v613_v11  ;;  %634 = vmax.xlane.f32.xlu0 %v633_v21  ;;  %v630_v15 = vsel %vm205_vm4, %v626_v8, -inf }
 0x627   :  { %631 = vmax.xlane.f32.xlu1 %v630_v15  ;;  %v629_v17 = vadd.f32 %v625_v10, %v4286_v9 }
 0x628   :  { %v628_v19 = vadd.f32 %v624_v13, %v4286_v9 }
 0x629   :  { %v639_v20 = vsel %vm205_vm4, %v629_v17, -inf }
 0x62a   :  { %v636_v22 = vsel %vm205_vm4, %v628_v19, -inf }
 0x62b   :  { %640 = vmax.xlane.f32.xlu1 %v639_v20  ;;  %637 = vmax.xlane.f32.xlu0 %v636_v22 }
 0x63c   :  { %3759 = vrot.lane.b32.xlu1 %v4251_v37, %s3956_s5 }
 0x641   :  { %3754 = vrot.lane.b32.xlu0 %v4241_v58, %s3956_s5 }
 0x6b3   :  { %v635_v26 = vpop.xlane.xlu0 %634 }
 0x6b4   :  { %v643_v27 = vsub.f32 %v627_v6, %v635_v26  ;;  %v632_v29 = vpop.xlane.xlu1 %631 }
 0x6b5   :  { %v642_v30 = vsub.f32 %v626_v8, %v632_v29 }
 0x6b6   :  { %v648_v32 = vmul.f32 1.442695, %v643_v27 }
 0x6b7   :  { %v646_v61 = vmul.f32 1.442695, %v642_v30 }
 0x6b8   :  { %3835 = vpow2.f32 %v648_v32  ;;  %v641_v35 = vpop.xlane.xlu1 %640  ;;  %v638_v38 = vpop.xlane.xlu0 %637 }
 0x6b9   :  { %3837 = vpow2.f32 %v646_v61  ;;  %v644_v39 = vsub.f32 %v628_v19, %v638_v38  ;;  %v645_v54 = vsub.f32 %v629_v17, %v641_v35 }
 0x6bb   :  { %v650_v23 = vmul.f32 1.442695, %v644_v39  ;;  %v652_v55 = vmul.f32 1.442695, %v645_v54 }
 0x6bc   :  { %v3760_v40 = vpop.permute.xlu1 %3759  ;;  %v3755_v41 = vpop.permute.xlu0 %3754 }
 0x6bd   :  { %v3757_v43 = vunpack.i.h.bf16 %v3755_v41  ;;  %3839 = vpow2.f32 %v650_v23  ;;  %v3762_v44 = vunpack.i.h.bf16 %v3760_v40  ;;  %v3761_v45 = vunpack.i.l.bf16 %v3760_v40 }
 0x6be   :  { %v3756_v24 = vunpack.i.l.bf16 %v3755_v41  ;;  %3841 = vpow2.f32 %v652_v55 }
 0x6bf   :  { %v3579_v48 = vpack.c.bf16 %v3762_v44, %v3761_v45 }
 0x6c0   :  { %v3575_v46 = vpack.c.bf16 %v3757_v43, %v3756_v24 }
 0x6c2   :  { %v3836_v47 = vpop.eup %3835  ;;  %3576 = vmatprep.subr.bf16.mxu0 %v3575_v46 }
 0x6c3   :  { %v3838_v49 = vpop.eup %3837  ;;  %3578 = vmatpush3.bf16.msra.mxu0 %v3575_v46  ;;  %v657_v50 = vsel %vm205_vm4, %v3836_v47, 0.0 }
 0x6c4   :  { %3580 = vmatprep.subr.bf16.mxu0 %v3579_v48  ;;  %658 = vadd.xlane.f32.xlu1 %v657_v50  ;;  %v654_v51 = vsel %vm205_vm4, %v3838_v49, 0.0 }
 0x6c5   :  { %655 = vadd.xlane.f32.xlu0 %v654_v51 }
 0x6c7   :  { %3582 = vmatpush3.bf16.msra.mxu0 %v3579_v48  ;;  %v3840_v52 = vpop.eup %3839 }
 0x6c8   :  { %v660_v53 = vsel %vm205_vm4, %v3840_v52, 0.0  ;;  %v3842_v56 = vpop.eup %3841 }
 0x6c9   :  { %661 = vadd.xlane.f32.xlu0 %v660_v53  ;;  %v663_v57 = vsel %vm205_vm4, %v3842_v56, 0.0 }
 0x6d5   :  { %3764 = vrot.lane.b32.xlu1 %v4241_v58, %s3957_s28 }
 0x6df   :  { %3769 = vrot.lane.b32.xlu0 %v4251_v37, %s3957_s28 }
 0x6e3   :  { %785 = vrot.lane.b32.xlu0 %v4233_v31, %s3958_s10 }
 0x6e7   :  { %789 = vrot.lane.b32.xlu0 %v4245_v34, %s3958_s10 }
 0x6f9   :  { %664 = vadd.xlane.f32.xlu1 %v663_v57 }
 0x70a   :  { %783 = vrot.lane.b32.xlu1 %v4235_v33, %s3958_s10 }
 0x70e   :  { %787 = vrot.lane.b32.xlu1 %v4247_v36, %s3958_s10 }
 0x751   :  { %v659_v59 = vpop.xlane.xlu1 %658 }
 0x752   :  { %3843 = vrcp.f32 %v659_v59  ;;  %v656_v60 = vpop.xlane.xlu0 %655 }
 0x753   :  { %3845 = vrcp.f32 %v656_v60 }
 0x755   :  { %v3765_v31 = vpop.permute.xlu1 %3764 }
 0x756   :  { %v3767_v62 = vunpack.i.h.bf16 %v3765_v31  ;;  %v3766_v63 = vunpack.i.l.bf16 %v3765_v31  ;;  %v662_v1 = vpop.xlane.xlu0 %661 }
 0x757   :  { %3847 = vrcp.f32 %v662_v1 }
 0x758   :  { %v3583_v34 = vpack.c.bf16 %v3767_v62, %v3766_v63 }
 0x75a   :  { %3585 = vmatprep.subr.msk.bf16.mxu0 %vm4260_vm7, %v3583_v34  ;;  %v3770_v2 = vpop.permute.xlu0 %3769 }
 0x75b   :  { %v3772_v33 = vunpack.i.h.bf16 %v3770_v2  ;;  %v3771_v5 = vunpack.i.l.bf16 %v3770_v2 }
 0x75c   :  { %v3844_v3 = vpop.eup %3843 }
 0x75d   :  { %v3846_v4 = vpop.eup %3845  ;;  %v669_v36 = vmul.f32 %v3844_v3, %v3836_v47  ;;  %v3589_v7 = vpack.c.bf16 %v3772_v33, %v3771_v5 }
 0x75e   :  { %v667_v6 = vmul.f32 %v3846_v4, %v3838_v49  ;;  %v786_v17 = vpop.permute.xlu0 %785 }
 0x760   :  { %3317 = vmatprep.mubr.msk.f32.mxu0 %vm205_vm4, %v667_v6 }
 0x761   :  { %3318 = vmatmul.mubr.msk.f32.vlgmr.msra.gmra.mrb[2].mxu0 %vm205_vm4, %v669_v36  ;;  %v3848_v8 = vpop.eup %3847 }
 0x762   :  { %3588 = vmatpush3.bf16.xpose.msk.msra.mxu0 %vm4260_vm7, %v3583_v34  ;;  %v671_v10 = vmul.f32 %v3848_v8, %v3840_v52  ;;  %v790_v20 = vpop.permute.xlu0 %789 }
 0x763   :  { %3591 = vmatprep.subr.msk.bf16.mxu0 %vm4260_vm7, %v3589_v7 }
 0x764   :  { %3320 = vmatprep.mubr.msk.f32.mxu0 %vm205_vm4, %v671_v10 }
 0x76a   :  { %3594 = vmatpush3.bf16.xpose.msk.msra.mxu0 %vm4260_vm7, %v3589_v7 }
 0x786   :  { %v665_v11 = vpop.xlane.xlu1 %664 }
 0x787   :  { %3849 = vrcp.f32 %v665_v11 }
 0x78a   :  { %v784_v13 = vpop.permute.xlu1 %783 }
 0x78e   :  { %v788_v19 = vpop.permute.xlu1 %787 }
 0x791   :  { %v3850_v21 = vpop.eup %3849 }
 0x792   :  { %v673_v15 = vmul.f32 %v3850_v21, %v3842_v56 }
 0x794   :  { %3321 = vmatmul.mubr.msk.f32.gmra.mrb[4].mxu0 %vm205_vm4, %v673_v15 }
 0x795   :  { %3331 = vmatprep.mubr.msk.f32.mxu0 %vm368_vm6, %v784_v13 }
 0x798   :  { %3332 = vmatmul.mubr.msk.f32.vlgmr.msra.gmra.mrb[6].mxu0 %vm368_vm6, %v786_v17 }
 0x799   :  { %3334 = vmatprep.mubr.msk.f32.mxu0 %vm368_vm6, %v788_v19 }
 0x79c   :  { %3335 = vmatmul.mubr.msk.f32.gmra.mrb[8].mxu0 %vm368_vm6, %v790_v20 }
 0x834   :  { %v4330_v22 = vpop.f32.mrb[2].mxu0 }
 0x835   :  { %v4332_v26 = vpop.f32.mrb[3].mxu0 }
 0x867   :  { %v4334_v27 = vpop.f32.mrb[4].mxu0 }
 0x868   :  { %v4336_v29 = vpop.f32.mrb[5].mxu0 }
 0x86b   :  { %v3333_v30 = vpop.f32.mrb[6].mxu0 }
 0x86c   :  { %v901_v32 = vmul.f32 0.25, %v3333_v30  ;;  %v881_v61 = vpop.f32.mrb[7].mxu0 }
 0x86d   :  { %v900_v35 = vmul.f32 0.25, %v881_v61 }
 0x86e   :  { %v905_v38 = vadd.f32 %v901_v32, %v4282_v0 }
 0x86f   :  { %v3336_v39 = vpop.f32.mrb[8].mxu0  ;;  %v904_v23 = vadd.f32 %v900_v35, %v4282_v0 }
 0x870   :  { %v903_v40 = vmul.f32 0.25, %v3336_v39  ;;  %v891_v41 = vpop.f32.mrb[9].mxu0  ;;  %v911_v43 = vsel %vm205_vm4, %v905_v38, -inf  ;;  %v1081_v39 = vld [vmem:[%s4803_s12] sm:$0xff] }
 0x871   :  { %v902_v44 = vmul.f32 0.25, %v891_v41  ;;  %912 = vmax.xlane.f32.xlu0 %v911_v43  ;;  %v908_v45 = vsel %vm205_vm4, %v904_v23, -inf  ;;  %v1084_v43 = vld [vmem:[%s4803_s12 + $0x18] sm:$0xff] }
 0x872   :  { %909 = vmax.xlane.f32.xlu1 %v908_v45  ;;  %v907_v24 = vadd.f32 %v903_v40, %v4286_v9  ;;  %v1083_v40 = vld [vmem:[%s4803_s12 + $0x10] sm:$0xff] }
 0x873   :  { %v906_v46 = vadd.f32 %v902_v44, %v4286_v9  ;;  %v3607_v44 = vpack.c.bf16 %v1084_v43, %v1083_v40 }
 0x874   :  { %v917_v47 = vsel %vm205_vm4, %v907_v24, -inf }
 0x875   :  { %v914_v48 = vsel %vm205_vm4, %v906_v46, -inf }
 0x876   :  { %918 = vmax.xlane.f32.xlu1 %v917_v47  ;;  %915 = vmax.xlane.f32.xlu0 %v914_v48 }
 0x8fe   :  { %v913_v49 = vpop.xlane.xlu0 %912 }
 0x8ff   :  { %v921_v50 = vsub.f32 %v905_v38, %v913_v49  ;;  %v910_v51 = vpop.xlane.xlu1 %909 }
 0x900   :  { %v920_v52 = vsub.f32 %v904_v23, %v910_v51  ;;  %v1082_v23 = vld [vmem:[%s4803_s12 + $0x8] sm:$0xff] }
 0x901   :  { %v926_v53 = vmul.f32 1.442695, %v921_v50  ;;  %v3603_v41 = vpack.c.bf16 %v1082_v23, %v1081_v39  ;;  %v1270_v39 = vld [vmem:[%s4805_s16 + $0x18] sm:$0xff] }
 0x902   :  { %v924_v54 = vmul.f32 1.442695, %v920_v52 }
 0x903   :  { %3851 = vpow2.f32 %v926_v53  ;;  %v919_v55 = vpop.xlane.xlu1 %918  ;;  %v916_v56 = vpop.xlane.xlu0 %915 }
 0x904   :  { %3853 = vpow2.f32 %v924_v54  ;;  %v923_v57 = vsub.f32 %v907_v24, %v919_v55  ;;  %v922_v59 = vsub.f32 %v906_v46, %v916_v56 }
 0x906   :  { %v930_v60 = vmul.f32 1.442695, %v923_v57  ;;  %v928_v31 = vmul.f32 1.442695, %v922_v59 }
 0x908   :  { %3855 = vpow2.f32 %v930_v60 }
 0x909   :  { %3857 = vpow2.f32 %v928_v31 }
 0x90d   :  { %v3852_v62 = vpop.eup %3851 }
 0x90e   :  { %v3854_v63 = vpop.eup %3853  ;;  %v935_v1 = vsel %vm205_vm4, %v3852_v62, 0.0 }
 0x90f   :  { %936 = vadd.xlane.f32.xlu1 %v935_v1  ;;  %v932_v34 = vsel %vm205_vm4, %v3854_v63, 0.0 }
 0x910   :  { %933 = vadd.xlane.f32.xlu0 %v932_v34 }
 0x912   :  { %v3856_v2 = vpop.eup %3855 }
 0x913   :  { %v3858_v3 = vpop.eup %3857  ;;  %v941_v4 = vsel %vm205_vm4, %v3856_v2, 0.0 }
 0x914   :  { %942 = vadd.xlane.f32.xlu1 %v941_v4  ;;  %v938_v33 = vsel %vm205_vm4, %v3858_v3, 0.0 }
 0x915   :  { %939 = vadd.xlane.f32.xlu0 %v938_v33 }
 0x925   :  { %3779 = vrot.lane.b32.xlu1 %v4251_v37, %s3959_s29 }
 0x92b   :  { %3774 = vrot.lane.b32.xlu0 %v4241_v58, %s3959_s29 }
 0x99c   :  { %v937_v5 = vpop.xlane.xlu1 %936 }
 0x99d   :  { %v934_v6 = vpop.xlane.xlu0 %933 }
 0x99e   :  { %3859 = vrcp.f32 %v934_v6 }
 0x99f   :  { %3861 = vrcp.f32 %v937_v5 }
 0x9a1   :  { %v943_v36 = vpop.xlane.xlu1 %942 }
 0x9a2   :  { %v940_v7 = vpop.xlane.xlu0 %939 }
 0x9a3   :  { %3863 = vrcp.f32 %v940_v7 }
 0x9a4   :  { %3865 = vrcp.f32 %v943_v36 }
 0x9a5   :  { %v3780_v8 = vpop.permute.xlu1 %3779 }
 0x9a6   :  { %v3775_v10 = vpop.permute.xlu0 %3774  ;;  %v3782_v11 = vunpack.i.h.bf16 %v3780_v8  ;;  %v3781_v21 = vunpack.i.l.bf16 %v3780_v8 }
 0x9a7   :  { %v3777_v13 = vunpack.i.h.bf16 %v3775_v10  ;;  %v3776_v15 = vunpack.i.l.bf16 %v3775_v10 }
 0x9a8   :  { %v3860_v17 = vpop.eup %3859  ;;  %v3599_v20 = vpack.c.bf16 %v3782_v11, %v3781_v21 }
 0x9a9   :  { %v3595_v19 = vpack.c.bf16 %v3777_v13, %v3776_v15  ;;  %v945_v37 = vmul.f32 %v3860_v17, %v3854_v63  ;;  %v3862_v58 = vpop.eup %3861 }
 0x9aa   :  { %v947_v32 = vmul.f32 %v3862_v58, %v3852_v62 }
 0x9ab   :  { %3596 = vmatprep.subr.bf16.mxu1 %v3595_v19  ;;  %3345 = vmatprep.mubr.msk.f32.mxu1 %vm205_vm4, %v945_v37 }
 0x9ac   :  { %3598 = vmatpush3.bf16.msra.mxu1 %v3595_v19 }
 0x9ad   :  { %3600 = vmatprep.subr.bf16.mxu1 %v3599_v20  ;;  %v3864_v30 = vpop.eup %3863 }
 0x9ae   :  { %v3866_v61 = vpop.eup %3865  ;;  %v949_v35 = vmul.f32 %v3864_v30, %v3858_v3 }
 0x9af   :  { %v951_v38 = vmul.f32 %v3866_v61, %v3856_v2  ;;  %v1268_v61 = vld [vmem:[%s4805_s16 + $0x8] sm:$0xff] }
 0x9b0   :  { %3602 = vmatpush3.bf16.msra.mxu1 %v3599_v20 }
 0x9b1   :  { %3604 = vmatprep.subr.bf16.mxu1 %v3603_v41 }
 0x9b3   :  { %3346 = vmatmul.mubr.msk.f32.vlgmr.msra.gmra.mrb[8].mxu1 %vm205_vm4, %v947_v32  ;;  %v1267_v32 = vld [vmem:[%s4805_s16] sm:$0xff] }
 0x9b4   :  { %3348 = vmatprep.mubr.msk.f32.mxu1 %vm205_vm4, %v949_v35  ;;  %3606 = vmatpush3.bf16.msra.mxu1 %v3603_v41  ;;  %v3611_v35 = vpack.c.bf16 %v1268_v61, %v1267_v32 }
 0x9b5   :  { %3608 = vmatprep.subr.bf16.mxu1 %v3607_v44 }
 0x9b6   :  { %3612 = vmatprep.subr.bf16.mxu0 %v3611_v35 }
 0x9b7   :  { %3349 = vmatmul.mubr.msk.f32.gmra.mrb[10].mxu1 %vm205_vm4, %v951_v38  ;;  %v1269_v38 = vld [vmem:[%s4805_s16 + $0x10] sm:$0xff]  ;;  %3614 = vmatpush3.bf16.msra.mxu0 %v3611_v35 }
 0x9b8   :  { %3610 = vmatpush3.bf16.msra.mxu1 %v3607_v44  ;;  %v3615_v23 = vpack.c.bf16 %v1270_v39, %v1269_v38 }
 0x9ba   :  { %3616 = vmatprep.subr.bf16.mxu0 %v3615_v23 }
 0x9bb   :  { %3618 = vmatpush3.bf16.msra.mxu0 %v3615_v23 }
 0xa86   :  { %v3347_v45 = vpop.f32.mrb[8].mxu1 }
 0xa87   :  { %1067 = vrot.lane.b32.xlu0 %v3347_v45, %s4825_s9  ;;  %v1042_v24 = vpop.f32.mrb[9].mxu1 }
 0xa88   :  { %1065 = vrot.lane.b32.xlu1 %v1042_v24, %s4825_s9 }
 0xa8a   :  { %v3350_v46 = vpop.f32.mrb[10].mxu1 }
 0xa8b   :  { %1071 = vrot.lane.b32.xlu0 %v3350_v46, %s4825_s9  ;;  %v1052_v47 = vpop.f32.mrb[11].mxu1 }
 0xa8c   :  { %1069 = vrot.lane.b32.xlu1 %v1052_v47, %s4825_s9 }
 0xaf9   :  { %v1068_v48 = vpop.permute.xlu0 %1067 }
 0xafa   :  { %v1066_v49 = vpop.permute.xlu1 %1065  ;;  %v1078_v51 = vsel %vm368_vm6, %v4330_v22, %v1068_v48  ;;  %v3009_v22 = vld [vmem:[%s4804_s13] ss:$0 sm:$0xff] }
 0xafb   :  { %v1077_v50 = vsel %vm368_vm6, %v4332_v26, %v1066_v49 }
 0xafc   :  { %3359 = vmatprep.mubr.msk.f32.mxu1 %vm205_vm4, %v1077_v50 }
 0xafd   :  { %3360 = vmatmul.mubr.msk.f32.vlgmr.msra.gmra.mrb[12].mxu1 %vm205_vm4, %v1078_v51  ;;  %v1072_v52 = vpop.permute.xlu0 %1071 }
 0xafe   :  { %v1070_v53 = vpop.permute.xlu1 %1069  ;;  %v1080_v55 = vsel %vm368_vm6, %v4334_v27, %v1072_v52 }
 0xaff   :  { %v1079_v54 = vsel %vm368_vm6, %v4336_v29, %v1070_v53  ;;  %v3014_v53 = vld [vmem:[%s4806_s14] ss:$0 sm:$0xff] }
 0xb00   :  { %3362 = vmatprep.mubr.msk.f32.mxu1 %vm205_vm4, %v1079_v54 }
 0xb01   :  { %3363 = vmatmul.mubr.msk.f32.gmra.mrb[14].mxu1 %vm205_vm4, %v1080_v55 }
 0xbd0   :  { %v3361_v26 = vpop.f32.mrb[12].mxu1 }
 0xbd1   :  { %v1176_v56 = vadd.f32 %v3361_v26, %v3009_v22  ;;  %v1170_v57 = vpop.f32.mrb[13].mxu1  ;;  %v3015_v26 = vld [vmem:[%s4807_s15] ss:$0 sm:$0xff] }
 0xbd2   :  { %v1171_v59 = vadd.f32 %v3009_v22, %v1170_v57 }
 0xbd3   :  { %v1190_v60 = vadd.f32 %v1176_v56, %v4214_v18 }
 0xbd4   :  { %v3364_v31 = vpop.f32.mrb[14].mxu1  ;;  %v1189_v29 = vadd.f32 %v1171_v59, %v4208_v12 }
 0xbd5   :  { %v1186_v62 = vadd.f32 %v3364_v31, %v3009_v22  ;;  %v1180_v63 = vpop.f32.mrb[15].mxu1  ;;  %v1198_v27 = vsel %vm205_vm4, %v1190_v60, 0.0 }
 0xbd6   :  { %v1181_v1 = vadd.f32 %v3009_v22, %v1180_v63  ;;  %1199 = vadd.xlane.f32.xlu0 %v1198_v27  ;;  %v1195_v34 = vsel %vm205_vm4, %v1189_v29, 0.0 }
 0xbd7   :  { %1196 = vadd.xlane.f32.xlu1 %v1195_v34  ;;  %v1192_v2 = vadd.f32 %v1186_v62, %v4226_v28 }
 0xbd8   :  { %v1191_v3 = vadd.f32 %v1181_v1, %v4220_v25 }
 0xbd9   :  { %v1204_v4 = vsel %vm205_vm4, %v1192_v2, 0.0 }
 0xbda   :  { %v1201_v18 = vsel %vm205_vm4, %v1191_v3, 0.0 }
 0xbdb   :  { %1202 = vadd.xlane.f32.xlu0 %v1201_v18  ;;  %1205 = vadd.xlane.f32.xlu1 %v1204_v4  ;;  %v1396_v4 = vld [vmem:[%s4808_s18 + $0x8] sm:$0xff] }
 0xc63   :  { %v1200_v12 = vpop.xlane.xlu0 %1199 }
 0xc64   :  { %v1208_v33 = vmul.f32 0.03125, %v1200_v12  ;;  %v1197_v5 = vpop.xlane.xlu1 %1196  ;;  %v1397_v12 = vld [vmem:[%s4808_s18 + $0x10] sm:$0xff] }
 0xc65   :  { %v1207_v6 = vmul.f32 0.03125, %v1197_v5 }
 0xc66   :  { %v1212_v36 = vsub.f32 %v1190_v60, %v1208_v33  ;;  %v1398_v33 = vld [vmem:[%s4808_s18 + $0x18] sm:$0xff] }
 0xc67   :  { %v1211_v7 = vsub.f32 %v1189_v29, %v1207_v6  ;;  %v3623_v5 = vpack.c.bf16 %v1398_v33, %v1397_v12  ;;  %v1399_v6 = vld [vmem:[%s4808_s18 + $0x20] sm:$0xff] }
 0xc68   :  { %v1203_v8 = vpop.xlane.xlu0 %1202  ;;  %v1206_v10 = vpop.xlane.xlu1 %1205  ;;  %v1216_v11 = vmul.f32 %v1212_v36, %v1212_v36 }
 0xc69   :  { %v1209_v21 = vmul.f32 0.03125, %v1203_v8  ;;  %v1210_v13 = vmul.f32 0.03125, %v1206_v10  ;;  %v1215_v28 = vmul.f32 %v1211_v7, %v1211_v7  ;;  %v1401_v8 = vld [vmem:[%s4808_s18 + $0x30] sm:$0xff]  ;;  %v1402_v10 = vld [vmem:[%s4808_s18 + $0x38] sm:$0xff] }
 0xc6a   :  { %v1222_v25 = vsel %vm205_vm4, %v1216_v11, 0.0  ;;  %v3631_v11 = vpack.c.bf16 %v1402_v10, %v1401_v8 }
 0xc6b   :  { %v1213_v15 = vsub.f32 %v1191_v3, %v1209_v21  ;;  %v1214_v17 = vsub.f32 %v1192_v2, %v1210_v13  ;;  %1223 = vadd.xlane.f32.xlu1 %v1222_v25  ;;  %v1219_v19 = vsel %vm205_vm4, %v1215_v28, 0.0  ;;  %v1395_v3 = vld [vmem:[%s4808_s18] sm:$0xff] }
 0xc6c   :  { %1220 = vadd.xlane.f32.xlu0 %v1219_v19  ;;  %v3619_v18 = vpack.c.bf16 %v1396_v4, %v1395_v3  ;;  %v3016_v21 = vld [vmem:[%s4809_s17] ss:$0 sm:$0xff] }
 0xc6d   :  { %v1217_v37 = vmul.f32 %v1213_v15, %v1213_v15  ;;  %v1218_v20 = vmul.f32 %v1214_v17, %v1214_v17 }
 0xc6e   :  { %3620 = vmatprep.subr.bf16.mxu1 %v3619_v18 }
 0xc6f   :  { %v1225_v58 = vsel %vm205_vm4, %v1217_v37, 0.0  ;;  %v1228_v30 = vsel %vm205_vm4, %v1218_v20, 0.0  ;;  %3622 = vmatpush3.bf16.msra.mxu1 %v3619_v18 }
 0xc70   :  { %1226 = vadd.xlane.f32.xlu0 %v1225_v58  ;;  %1229 = vadd.xlane.f32.xlu1 %v1228_v30 }
 0xc71   :  { %3624 = vmatprep.subr.bf16.mxu1 %v3623_v5 }
 0xc73   :  { %3626 = vmatpush3.bf16.msra.mxu1 %v3623_v5 }
 0xcf8   :  { %v1224_v40 = vpop.xlane.xlu1 %1223 }
 0xcf9   :  { %v1232_v41 = vmul.f32 0.03125, %v1224_v40  ;;  %v1221_v43 = vpop.xlane.xlu0 %1220 }
 0xcfa   :  { %v1231_v44 = vmul.f32 0.03125, %v1221_v43 }
 0xcfb   :  { %v1236_v45 = vadd.f32 1e-12, %v1232_v41 }
 0xcfc   :  { %v1235_v24 = vadd.f32 1e-12, %v1231_v44 }
 0xcfd   :  { %3867 = vrsqrt.f32 %v1236_v45  ;;  %v1227_v46 = vpop.xlane.xlu0 %1226  ;;  %v1230_v47 = vpop.xlane.xlu1 %1229 }
 0xcfe   :  { %3869 = vrsqrt.f32 %v1235_v24  ;;  %v1233_v48 = vmul.f32 0.03125, %v1227_v46  ;;  %v1234_v49 = vmul.f32 0.03125, %v1230_v47 }
 0xd00   :  { %v1237_v50 = vadd.f32 1e-12, %v1233_v48  ;;  %v1238_v51 = vadd.f32 1e-12, %v1234_v49 }
 0xd02   :  { %3871 = vrsqrt.f32 %v1237_v50 }
 0xd03   :  { %3873 = vrsqrt.f32 %v1238_v51 }
 0xd07   :  { %v3868_v52 = vpop.eup %3867 }
 0xd08   :  { %v3870_v54 = vpop.eup %3869  ;;  %v1244_v55 = vmul.f32 %v3868_v52, %v1212_v36  ;;  %v1400_v36 = vld [vmem:[%s4808_s18 + $0x28] sm:$0xff]  ;;  %v3021_v52 = vld [vmem:[%s4810_s19] ss:$0 sm:$0xff] }
 0xd09   :  { %v1243_v22 = vmul.f32 %v3870_v54, %v1211_v7  ;;  %v3627_v7 = vpack.c.bf16 %v1400_v36, %v1399_v6 }
 0xd0a   :  { %v1254_v56 = vmul.f32 %v3014_v53, %v1244_v55 }
 0xd0b   :  { %v1253_v57 = vmul.f32 %v3014_v53, %v1243_v22  ;;  %3628 = vmatprep.subr.bf16.mxu1 %v3627_v7 }
 0xd0c   :  { %v3872_v59 = vpop.eup %3871  ;;  %v4421_v62 = vadd.f32 %v3015_v26, %v1254_v56  ;;  %3630 = vmatpush3.bf16.msra.mxu1 %v3627_v7 }
 0xd0d   :  { %v3874_v60 = vpop.eup %3873  ;;  %v4419_v31 = vadd.f32 %v3015_v26, %v1253_v57  ;;  %v1245_v29 = vmul.f32 %v3872_v59, %v1213_v15  ;;  %3632 = vmatprep.subr.bf16.mxu1 %v3631_v11 }
 0xd0e   :  { %v1246_v63 = vmul.f32 %v3874_v60, %v1214_v17 }
 0xd0f   :  { %3373 = vmatprep.mubr.msk.f32.mxu0 %vm205_vm4, %v4419_v31  ;;  %v1255_v27 = vmul.f32 %v3014_v53, %v1245_v29 }
 0xd10   :  { %3374 = vmatmul.mubr.msk.f32.vlgmr.msra.gmra.mrb[10].mxu0 %vm205_vm4, %v4421_v62  ;;  %v1256_v1 = vmul.f32 %v3014_v53, %v1246_v63  ;;  %3634 = vmatpush3.bf16.msra.mxu1 %v3631_v11 }
 0xd11   :  { %v4427_v34 = vadd.f32 %v3015_v26, %v1255_v27 }
 0xd12   :  { %v4429_v2 = vadd.f32 %v3015_v26, %v1256_v1 }
 0xd13   :  { %3376 = vmatprep.mubr.msk.f32.mxu0 %vm205_vm4, %v4427_v34 }
 0xd14   :  { %3377 = vmatmul.mubr.msk.f32.gmra.mrb[12].mxu0 %vm205_vm4, %v4429_v2 }
 0xde3   :  { %v3375_v13 = vpop.f32.mrb[10].mxu0 }
 0xde4   :  { %v1362_v28 = vadd.f32 %v3375_v13, %v3016_v21  ;;  %v1356_v25 = vpop.f32.mrb[11].mxu0 }
 0xde5   :  { %v1357_v15 = vadd.f32 %v3016_v21, %v1356_v25 }
 0xde6   :  { %v1380_v17 = vmul.f32 0.70710677, %v1362_v28  ;;  %v1376_v41 = vmul.f32 0.5, %v1362_v28 }
 0xde7   :  { %v1379_v19 = vmul.f32 0.70710677, %v1357_v15  ;;  %v3378_v37 = vpop.f32.mrb[12].mxu0  ;;  %v1375_v23 = vmul.f32 0.5, %v1357_v15 }
 0xde8   :  { %3875 = verf.f32 %v1380_v17  ;;  %v1372_v20 = vadd.f32 %v3378_v37, %v3016_v21  ;;  %v1366_v58 = vpop.f32.mrb[13].mxu0  ;;  %v3028_v37 = vld [vmem:[%s4846_s4 + $0x20] sm:$0xff] }
 0xde9   :  { %3877 = verf.f32 %v1379_v19  ;;  %v1367_v30 = vadd.f32 %v3016_v21, %v1366_v58 }
 0xdea   :  { %v1382_v32 = vmul.f32 0.70710677, %v1372_v20  ;;  %v1378_v49 = vmul.f32 0.5, %v1372_v20  ;;  %v3029_v20 = vld [vmem:[%s4846_s4 + $0x28] sm:$0xff] }
 0xdeb   :  { %v1381_v61 = vmul.f32 0.70710677, %v1367_v30  ;;  %v1377_v47 = vmul.f32 0.5, %v1367_v30  ;;  %v3635_v58 = vpack.c.bf16 %v3029_v20, %v3028_v37  ;;  %v3030_v30 = vld [vmem:[%s4846_s4 + $0x30] sm:$0xff] }
 0xdec   :  { %3879 = verf.f32 %v1382_v32  ;;  %v3031_v32 = vld [vmem:[%s4846_s4 + $0x38] sm:$0xff] }
 0xded   :  { %3881 = verf.f32 %v1381_v61  ;;  %3636 = vmatprep.subr.bf16.mxu0 %v3635_v58  ;;  %v3639_v61 = vpack.c.bf16 %v3031_v32, %v3030_v30 }
 0xdee   :  { %3638 = vmatpush3.bf16.msra.mxu0 %v3635_v58 }
 0xdef   :  { %3640 = vmatprep.subr.bf16.mxu0 %v3639_v61 }
 0xdf2   :  { %v3876_v35 = vpop.eup %3875  ;;  %3642 = vmatpush3.bf16.msra.mxu0 %v3639_v61 }
 0xdf3   :  { %v3878_v38 = vpop.eup %3877  ;;  %v1388_v39 = vadd.f32 1.0, %v3876_v35 }
 0xdf4   :  { %v1387_v40 = vadd.f32 1.0, %v3878_v38 }
 0xdf5   :  { %v1392_v24 = vmul.f32 %v1388_v39, %v1376_v41 }
 0xdf6   :  { %v3880_v43 = vpop.eup %3879  ;;  %v1391_v44 = vmul.f32 %v1387_v40, %v1375_v23 }
 0xdf7   :  { %v3882_v45 = vpop.eup %3881  ;;  %v1390_v46 = vadd.f32 1.0, %v3880_v43 }
 0xdf8   :  { %v1389_v48 = vadd.f32 1.0, %v3882_v45  ;;  %3395 = vmatprep.mubr.msk.f32.mxu1 %vm1410_vm14, %v1391_v44 }
 0xdf9   :  { %3396 = vmatmul.mubr.msk.f32.vlgmr.msra.gmra.mrb[16].mxu1 %vm1410_vm14, %v1392_v24  ;;  %v1394_v51 = vmul.f32 %v1390_v46, %v1378_v49  ;;  %v3026_v49 = vld [vmem:[%s4811_s20] ss:$0 sm:$0xff] }
 0xdfa   :  { %v1393_v50 = vmul.f32 %v1389_v48, %v1377_v47 }
 0xdfc   :  { %3398 = vmatprep.mubr.msk.f32.mxu1 %vm1410_vm14, %v1393_v50 }
 0xdfd   :  { %3399 = vmatmul.mubr.msk.f32.gmra.mrb[18].mxu1 %vm1410_vm14, %v1394_v51 }
 0xecc   :  { %v3397_v53 = vpop.f32.mrb[16].mxu1 }
 0xecd   :  { %v1495_v54 = vadd.f32 %v3397_v53, %v3021_v52  ;;  %v1489_v55 = vpop.f32.mrb[17].mxu1  ;;  %v3027_v53 = vld [vmem:[%s4812_s21] ss:$0 sm:$0xff] }
 0xece   :  { %v1490_v22 = vadd.f32 %v3021_v52, %v1489_v55 }
 0xecf   :  { %v1509_v26 = vadd.f32 %v1495_v54, %v4421_v62 }
 0xed0   :  { %v3400_v56 = vpop.f32.mrb[18].mxu1  ;;  %v1508_v57 = vadd.f32 %v1490_v22, %v4419_v31 }
 0xed1   :  { %v1505_v59 = vadd.f32 %v3400_v56, %v3021_v52  ;;  %v1499_v60 = vpop.f32.mrb[19].mxu1  ;;  %v1517_v29 = vsel %vm205_vm4, %v1509_v26, 0.0 }
 0xed2   :  { %v1500_v63 = vadd.f32 %v3021_v52, %v1499_v60  ;;  %1518 = vadd.xlane.f32.xlu1 %v1517_v29  ;;  %v1514_v27 = vsel %vm205_vm4, %v1508_v57, 0.0 }
 0xed3   :  { %1515 = vadd.xlane.f32.xlu0 %v1514_v27  ;;  %v1511_v1 = vadd.f32 %v1505_v59, %v4429_v2 }
 0xed4   :  { %v1510_v3 = vadd.f32 %v1500_v63, %v4427_v34 }
 0xed5   :  { %v1523_v4 = vsel %vm205_vm4, %v1511_v1, 0.0 }
 0xed6   :  { %1524 = vadd.xlane.f32.xlu1 %v1523_v4  ;;  %v1520_v62 = vsel %vm205_vm4, %v1510_v3, 0.0 }
 0xed7   :  { %1521 = vadd.xlane.f32.xlu0 %v1520_v62 }
 0xf5f   :  { %v1519_v31 = vpop.xlane.xlu1 %1518 }
 0xf60   :  { %v1527_v18 = vmul.f32 0.03125, %v1519_v31  ;;  %v1516_v12 = vpop.xlane.xlu0 %1515 }
 0xf61   :  { %v1526_v33 = vmul.f32 0.03125, %v1516_v12 }
 0xf62   :  { %v1531_v5 = vsub.f32 %v1509_v26, %v1527_v18 }
 0xf63   :  { %v1530_v6 = vsub.f32 %v1508_v57, %v1526_v33  ;;  %v1525_v36 = vpop.xlane.xlu1 %1524 }
 0xf64   :  { %v1529_v7 = vmul.f32 0.03125, %v1525_v36  ;;  %v1522_v8 = vpop.xlane.xlu0 %1521  ;;  %v1535_v10 = vmul.f32 %v1531_v5, %v1531_v5 }
 0xf65   :  { %v1528_v11 = vmul.f32 0.03125, %v1522_v8  ;;  %v1534_v2 = vmul.f32 %v1530_v6, %v1530_v6 }
 0xf66   :  { %v1533_v21 = vsub.f32 %v1511_v1, %v1529_v7  ;;  %v1541_v34 = vsel %vm205_vm4, %v1535_v10, 0.0 }
 0xf67   :  { %v1532_v13 = vsub.f32 %v1510_v3, %v1528_v11  ;;  %1542 = vadd.xlane.f32.xlu1 %v1541_v34  ;;  %v1538_v28 = vsel %vm205_vm4, %v1534_v2, 0.0  ;;  %v3033_v3 = vld [vmem:[%s4847_s11 + $0x1] ss:$0 sm:$0xff] }
 0xf68   :  { %1539 = vadd.xlane.f32.xlu0 %v1538_v28  ;;  %v1537_v25 = vmul.f32 %v1533_v21, %v1533_v21 }
 0xf69   :  { %v1536_v15 = vmul.f32 %v1532_v13, %v1532_v13 }
 0xf6a   :  { %v1547_v17 = vsel %vm205_vm4, %v1537_v25, 0.0 }
 0xf6b   :  { %1548 = vadd.xlane.f32.xlu1 %v1547_v17  ;;  %v1544_v19 = vsel %vm205_vm4, %v1536_v15, 0.0 }
 0xf6c   :  { %1545 = vadd.xlane.f32.xlu0 %v1544_v19 }
 0xff4   :  { %v1543_v35 = vpop.xlane.xlu1 %1542 }
 0xff5   :  { %v1551_v38 = vmul.f32 0.03125, %v1543_v35  ;;  %v1540_v39 = vpop.xlane.xlu0 %1539 }
 0xff6   :  { %v1550_v23 = vmul.f32 0.03125, %v1540_v39 }
 0xff7   :  { %v1555_v40 = vadd.f32 1e-12, %v1551_v38 }
 0xff8   :  { %v1554_v41 = vadd.f32 1e-12, %v1550_v23  ;;  %v1549_v43 = vpop.xlane.xlu1 %1548 }
 0xff9   :  { %3883 = vrsqrt.f32 %v1555_v40  ;;  %v1553_v44 = vmul.f32 0.03125, %v1549_v43  ;;  %v1546_v45 = vpop.xlane.xlu0 %1545 }
 0xffa   :  { %3885 = vrsqrt.f32 %v1554_v41  ;;  %v1552_v24 = vmul.f32 0.03125, %v1546_v45 }
 0xffb   :  { %v1557_v46 = vadd.f32 1e-12, %v1553_v44 }
 0xffc   :  { %v1556_v47 = vadd.f32 1e-12, %v1552_v24 }
 0xffd   :  { %3887 = vrsqrt.f32 %v1557_v46 }
 0xffe   :  { %3889 = vrsqrt.f32 %v1556_v47 }
0x1003   :  { %v3884_v48 = vpop.eup %3883 }
0x1004   :  { %v3886_v50 = vpop.eup %3885  ;;  %v1563_v51 = vmul.f32 %v3884_v48, %v1531_v5 }
0x1005   :  { %v1562_v52 = vmul.f32 %v3886_v50, %v1530_v6 }
0x1006   :  { %v1573_v54 = vmul.f32 %v3026_v49, %v1563_v51 }
0x1007   :  { %v3888_v55 = vpop.eup %3887  ;;  %v1572_v22 = vmul.f32 %v3026_v49, %v1562_v52 }
0x1008   :  { %v3890_v26 = vpop.eup %3889  ;;  %v1565_v56 = vmul.f32 %v3888_v55, %v1533_v21  ;;  %v4501_v60 = vadd.f32 %v3027_v53, %v1573_v54 }
0x1009   :  { %v4499_v57 = vadd.f32 %v3027_v53, %v1572_v22  ;;  %v1564_v59 = vmul.f32 %v3890_v26, %v1532_v13 }
0x100a   :  { %v1575_v29 = vmul.f32 %v3026_v49, %v1565_v56 }
0x100b   :  { %3409 = vmatprep.mubr.msk.f32.mxu0 %vm205_vm4, %v4499_v57  ;;  %v1574_v63 = vmul.f32 %v3026_v49, %v1564_v59 }
0x100c   :  { %3410 = vmatmul.mubr.msk.f32.vlgmr.msra.gmra.mrb[14].mxu0 %vm205_vm4, %v4501_v60  ;;  %v4509_v1 = vadd.f32 %v3027_v53, %v1575_v29 }
0x100d   :  { %v4507_v27 = vadd.f32 %v3027_v53, %v1574_v63 }
0x100f   :  { %3412 = vmatprep.mubr.msk.f32.mxu0 %vm205_vm4, %v4507_v27 }
0x1010   :  { %3413 = vmatmul.mubr.msk.f32.gmra.mrb[16].mxu0 %vm205_vm4, %v4509_v1 }
0x10df   :  { %v3411_v4 = vpop.f32.mrb[14].mxu0 }
0x10e0   :  { %v4518_v62 = vadd.f32 %v3411_v4, %v3033_v3  ;;  %v1677_v31 = vpop.f32.mrb[15].mxu0 }
0x10e1   :  { %v4520_v18 = vadd.f32 %v3033_v3, %v1677_v31 }
0x10e3   :  { %v3414_v12 = vpop.f32.mrb[16].mxu0  ;;  %3423 = vmatprep.mubr.msk.f32.mxu0 %vm368_vm6, %v4520_v18  ;;  %v4526_v33 = vpack.i.bf16 %v4518_v62, %v4520_v18 }
0x10e4   :  { %v4528_v5 = vadd.f32 %v3414_v12, %v3033_v3  ;;  %v1687_v6 = vpop.f32.mrb[17].mxu0 }
0x10e5   :  { %v4530_v36 = vadd.f32 %v3033_v3, %v1687_v6  ;;  %3784 = vrot.lane.b32.xlu0 %v4526_v33, %s3951_s30 }
0x10e7   :  { %v4536_v7 = vpack.i.bf16 %v4528_v5, %v4530_v36 }
0x10e9   :  { %3789 = vrot.lane.b32.xlu1 %v4536_v7, %s3951_s30 }
0x1157   :  { %v3785_v8 = vpop.permute.xlu0 %3784 }
0x1158   :  { %v3787_v10 = vunpack.i.h.bf16 %v3785_v8  ;;  %v3786_v11 = vunpack.i.l.bf16 %v3785_v8 }
0x115a   :  { %v3643_v2 = vpack.c.bf16 %v3787_v10, %v3786_v11 }
0x115b   :  { %v3790_v21 = vpop.permute.xlu1 %3789 }
0x115c   :  { %v3792_v34 = vunpack.i.h.bf16 %v3790_v21  ;;  %v3791_v13 = vunpack.i.l.bf16 %v3790_v21  ;;  %3645 = vmatprep.subr.msk.bf16.mxu0 %vm4260_vm7, %v3643_v2 }
0x115d   :  { %3648 = vmatpush3.bf16.xpose.msk.msra.mxu0 %vm4260_vm7, %v3643_v2 }
0x115e   :  { %v3649_v28 = vpack.c.bf16 %v3792_v34, %v3791_v13 }
0x1160   :  { %3651 = vmatprep.subr.msk.bf16.mxu0 %vm4260_vm7, %v3649_v28 }
0x1165   :  { %3654 = vmatpush3.bf16.xpose.msk.msra.mxu0 %vm4260_vm7, %v3649_v28 }
0x116c   :  { %3424 = vmatmul.mubr.msk.f32.vlgmr.msra.gmra.mrb[18].mxu0 %vm368_vm6, %v4518_v62 }
0x116d   :  { %3426 = vmatprep.mubr.msk.f32.mxu0 %vm368_vm6, %v4530_v36 }
0x1170   :  { %3427 = vmatmul.mubr.msk.f32.gmra.mrb[20].mxu0 %vm368_vm6, %v4528_v5 }
0x123f   :  { %v3425_v25 = vpop.f32.mrb[18].mxu0 }
0x1240   :  { %v1810_v15 = vmul.f32 0.25, %v3425_v25  ;;  %v1790_v17 = vpop.f32.mrb[19].mxu0 }
0x1241   :  { %v1809_v19 = vmul.f32 0.25, %v1790_v17 }
0x1242   :  { %v1814_v37 = vadd.f32 %v1810_v15, %v4282_v0 }
0x1243   :  { %v3428_v20 = vpop.f32.mrb[20].mxu0  ;;  %v1813_v58 = vadd.f32 %v1809_v19, %v4282_v0 }
0x1244   :  { %v1812_v30 = vmul.f32 0.25, %v3428_v20  ;;  %v1800_v32 = vpop.f32.mrb[21].mxu0  ;;  %v1820_v61 = vsel %vm205_vm4, %v1814_v37, -inf }
0x1245   :  { %v1811_v35 = vmul.f32 0.25, %v1800_v32  ;;  %1821 = vmax.xlane.f32.xlu0 %v1820_v61  ;;  %v1817_v38 = vsel %vm205_vm4, %v1813_v58, -inf }
0x1246   :  { %1818 = vmax.xlane.f32.xlu1 %v1817_v38  ;;  %v1816_v39 = vadd.f32 %v1812_v30, %v4286_v9 }
0x1247   :  { %v1815_v23 = vadd.f32 %v1811_v35, %v4286_v9 }
0x1248   :  { %v1826_v40 = vsel %vm205_vm4, %v1816_v39, -inf }
0x1249   :  { %v1823_v41 = vsel %vm205_vm4, %v1815_v23, -inf }
0x124a   :  { %1827 = vmax.xlane.f32.xlu1 %v1826_v40  ;;  %1824 = vmax.xlane.f32.xlu0 %v1823_v41 }
0x125b   :  { %3799 = vrot.lane.b32.xlu1 %v4536_v7, %s3956_s5 }
0x1260   :  { %3794 = vrot.lane.b32.xlu0 %v4526_v33, %s3956_s5 }
0x12d2   :  { %v1822_v43 = vpop.xlane.xlu0 %1821 }
0x12d3   :  { %v1830_v44 = vsub.f32 %v1814_v37, %v1822_v43  ;;  %v1819_v45 = vpop.xlane.xlu1 %1818 }
0x12d4   :  { %v1829_v24 = vsub.f32 %v1813_v58, %v1819_v45 }
0x12d5   :  { %v1835_v46 = vmul.f32 1.442695, %v1830_v44 }
0x12d6   :  { %v1833_v47 = vmul.f32 1.442695, %v1829_v24 }
0x12d7   :  { %3891 = vpow2.f32 %v1835_v46  ;;  %v1828_v48 = vpop.xlane.xlu1 %1827  ;;  %v1825_v49 = vpop.xlane.xlu0 %1824 }
0x12d8   :  { %3893 = vpow2.f32 %v1833_v47  ;;  %v1831_v50 = vsub.f32 %v1815_v23, %v1825_v49  ;;  %v1832_v6 = vsub.f32 %v1816_v39, %v1828_v48 }
0x12da   :  { %v1837_v51 = vmul.f32 1.442695, %v1831_v50  ;;  %v1839_v8 = vmul.f32 1.442695, %v1832_v6 }
0x12db   :  { %v3800_v52 = vpop.permute.xlu1 %3799  ;;  %v3795_v53 = vpop.permute.xlu0 %3794 }
0x12dc   :  { %v3797_v54 = vunpack.i.h.bf16 %v3795_v53  ;;  %3895 = vpow2.f32 %v1837_v51  ;;  %v3802_v55 = vunpack.i.h.bf16 %v3800_v52  ;;  %v3801_v22 = vunpack.i.l.bf16 %v3800_v52 }
0x12dd   :  { %v3796_v26 = vunpack.i.l.bf16 %v3795_v53  ;;  %3897 = vpow2.f32 %v1839_v8 }
0x12de   :  { %v3659_v29 = vpack.c.bf16 %v3802_v55, %v3801_v22 }
0x12df   :  { %v3655_v56 = vpack.c.bf16 %v3797_v54, %v3796_v26 }
0x12e1   :  { %v3892_v59 = vpop.eup %3891  ;;  %3656 = vmatprep.subr.bf16.mxu1 %v3655_v56 }
0x12e2   :  { %v3894_v63 = vpop.eup %3893  ;;  %3658 = vmatpush3.bf16.msra.mxu1 %v3655_v56  ;;  %v1844_v3 = vsel %vm205_vm4, %v3892_v59, 0.0 }
0x12e3   :  { %3660 = vmatprep.subr.bf16.mxu1 %v3659_v29  ;;  %1845 = vadd.xlane.f32.xlu1 %v1844_v3  ;;  %v1841_v4 = vsel %vm205_vm4, %v3894_v63, 0.0 }
0x12e4   :  { %1842 = vadd.xlane.f32.xlu0 %v1841_v4 }
0x12e6   :  { %3662 = vmatpush3.bf16.msra.mxu1 %v3659_v29  ;;  %v3896_v31 = vpop.eup %3895 }
0x12e7   :  { %v1847_v12 = vsel %vm205_vm4, %v3896_v31, 0.0  ;;  %v3898_v10 = vpop.eup %3897 }
0x12e8   :  { %1848 = vadd.xlane.f32.xlu0 %v1847_v12  ;;  %v1850_v11 = vsel %vm205_vm4, %v3898_v10, 0.0 }
0x12f4   :  { %3804 = vrot.lane.b32.xlu1 %v4526_v33, %s3957_s28 }
0x12fe   :  { %3809 = vrot.lane.b32.xlu0 %v4536_v7, %s3957_s28 }
0x1302   :  { %1972 = vrot.lane.b32.xlu0 %v4518_v62, %s3958_s10 }
0x1306   :  { %1976 = vrot.lane.b32.xlu0 %v4528_v5, %s3958_s10 }
0x1318   :  { %1851 = vadd.xlane.f32.xlu1 %v1850_v11 }
0x1329   :  { %1970 = vrot.lane.b32.xlu1 %v4520_v18, %s3958_s10 }
0x132d   :  { %1974 = vrot.lane.b32.xlu1 %v4530_v36, %s3958_s10 }
0x1370   :  { %v1846_v2 = vpop.xlane.xlu1 %1845 }
0x1371   :  { %3899 = vrcp.f32 %v1846_v2  ;;  %v1843_v21 = vpop.xlane.xlu0 %1842 }
0x1372   :  { %3901 = vrcp.f32 %v1843_v21 }
0x1374   :  { %v3805_v62 = vpop.permute.xlu1 %3804 }
0x1375   :  { %v3807_v34 = vunpack.i.h.bf16 %v3805_v62  ;;  %v3806_v13 = vunpack.i.l.bf16 %v3805_v62  ;;  %v1849_v28 = vpop.xlane.xlu0 %1848 }
0x1376   :  { %3903 = vrcp.f32 %v1849_v28 }
0x1377   :  { %v3663_v5 = vpack.c.bf16 %v3807_v34, %v3806_v13 }
0x1379   :  { %3665 = vmatprep.subr.msk.bf16.mxu1 %vm4260_vm7, %v3663_v5  ;;  %v3810_v25 = vpop.permute.xlu0 %3809 }
0x137a   :  { %v3812_v18 = vunpack.i.h.bf16 %v3810_v25  ;;  %v3811_v19 = vunpack.i.l.bf16 %v3810_v25 }
0x137b   :  { %v3900_v15 = vpop.eup %3899 }
0x137c   :  { %v3902_v17 = vpop.eup %3901  ;;  %v1856_v36 = vmul.f32 %v3900_v15, %v3892_v59  ;;  %v3669_v20 = vpack.c.bf16 %v3812_v18, %v3811_v19 }
0x137d   :  { %v1854_v37 = vmul.f32 %v3902_v17, %v3894_v63  ;;  %v1973_v39 = vpop.permute.xlu0 %1972 }
0x137f   :  { %3437 = vmatprep.mubr.msk.f32.mxu1 %vm205_vm4, %v1854_v37 }
0x1380   :  { %3438 = vmatmul.mubr.msk.f32.vlgmr.msra.gmra.mrb[20].mxu1 %vm205_vm4, %v1856_v36  ;;  %v3904_v58 = vpop.eup %3903 }
0x1381   :  { %3668 = vmatpush3.bf16.xpose.msk.msra.mxu1 %vm4260_vm7, %v3663_v5  ;;  %v1858_v30 = vmul.f32 %v3904_v58, %v3896_v31  ;;  %v1977_v40 = vpop.permute.xlu0 %1976 }
0x1382   :  { %3671 = vmatprep.subr.msk.bf16.mxu1 %vm4260_vm7, %v3669_v20 }
0x1383   :  { %3440 = vmatprep.mubr.msk.f32.mxu1 %vm205_vm4, %v1858_v30 }
0x1389   :  { %3674 = vmatpush3.bf16.xpose.msk.msra.mxu1 %vm4260_vm7, %v3669_v20 }
0x13a5   :  { %v1852_v32 = vpop.xlane.xlu1 %1851 }
0x13a6   :  { %3905 = vrcp.f32 %v1852_v32 }
0x13a9   :  { %v1971_v35 = vpop.permute.xlu1 %1970 }
0x13ad   :  { %v1975_v23 = vpop.permute.xlu1 %1974 }
0x13b0   :  { %v3906_v61 = vpop.eup %3905 }
0x13b1   :  { %v1860_v38 = vmul.f32 %v3906_v61, %v3898_v10 }
0x13b3   :  { %3441 = vmatmul.mubr.msk.f32.gmra.mrb[22].mxu1 %vm205_vm4, %v1860_v38 }
0x13b4   :  { %3451 = vmatprep.mubr.msk.f32.mxu1 %vm368_vm6, %v1971_v35 }
0x13b7   :  { %3452 = vmatmul.mubr.msk.f32.vlgmr.msra.gmra.mrb[24].mxu1 %vm368_vm6, %v1973_v39 }
0x13b8   :  { %3454 = vmatprep.mubr.msk.f32.mxu1 %vm368_vm6, %v1975_v23 }
0x13bb   :  { %3455 = vmatmul.mubr.msk.f32.gmra.mrb[26].mxu1 %vm368_vm6, %v1977_v40 }
0x1453   :  { %v4598_v42 = vpop.f32.mrb[20].mxu1 }
0x1454   :  { %v4600_v41 = vpop.f32.mrb[21].mxu1 }
0x1486   :  { %v4602_v43 = vpop.f32.mrb[22].mxu1 }
0x1487   :  { %v4604_v44 = vpop.f32.mrb[23].mxu1 }
0x148a   :  { %v3453_v45 = vpop.f32.mrb[24].mxu1 }
0x148b   :  { %v2088_v24 = vmul.f32 0.25, %v3453_v45  ;;  %v2068_v46 = vpop.f32.mrb[25].mxu1 }
0x148c   :  { %v2087_v47 = vmul.f32 0.25, %v2068_v46  ;;  %v3062_v46 = vld [vmem:[%s4803_s12 + $0x20] sm:$0xff] }
0x148d   :  { %v2092_v48 = vadd.f32 %v2088_v24, %v4282_v0 }
0x148e   :  { %v3456_v49 = vpop.f32.mrb[26].mxu1  ;;  %v2091_v50 = vadd.f32 %v2087_v47, %v4282_v0  ;;  %v3063_v47 = vld [vmem:[%s4803_s12 + $0x28] sm:$0xff] }
0x148f   :  { %v2090_v51 = vmul.f32 0.25, %v3456_v49  ;;  %v2078_v52 = vpop.f32.mrb[27].mxu1  ;;  %v2098_v53 = vsel %vm205_vm4, %v2092_v48, -inf  ;;  %v3683_v49 = vpack.c.bf16 %v3063_v47, %v3062_v46 }
0x1490   :  { %v2089_v54 = vmul.f32 0.25, %v2078_v52  ;;  %2099 = vmax.xlane.f32.xlu0 %v2098_v53  ;;  %v2095_v55 = vsel %vm205_vm4, %v2091_v50, -inf }
0x1491   :  { %2096 = vmax.xlane.f32.xlu1 %v2095_v55  ;;  %v2094_v22 = vadd.f32 %v2090_v51, %v4286_v9 }
0x1492   :  { %v2093_v26 = vadd.f32 %v2089_v54, %v4286_v9 }
0x1493   :  { %v2104_v56 = vsel %vm205_vm4, %v2094_v22, -inf }
0x1494   :  { %v2101_v59 = vsel %vm205_vm4, %v2093_v26, -inf }
0x1495   :  { %2105 = vmax.xlane.f32.xlu1 %v2104_v56  ;;  %2102 = vmax.xlane.f32.xlu0 %v2101_v59 }
0x151d   :  { %v2100_v0 = vpop.xlane.xlu0 %2099 }
0x151e   :  { %v2108_v29 = vsub.f32 %v2092_v48, %v2100_v0  ;;  %v2097_v63 = vpop.xlane.xlu1 %2096  ;;  %v3064_v48 = vld [vmem:[%s4803_s12 + $0x30] sm:$0xff] }
0x151f   :  { %v2107_v3 = vsub.f32 %v2091_v50, %v2097_v63  ;;  %v3065_v50 = vld [vmem:[%s4803_s12 + $0x38] sm:$0xff] }
0x1520   :  { %v2113_v4 = vmul.f32 1.442695, %v2108_v29  ;;  %v3687_v51 = vpack.c.bf16 %v3065_v50, %v3064_v48 }
0x1521   :  { %v2111_v31 = vmul.f32 1.442695, %v2107_v3 }
0x1522   :  { %3907 = vpow2.f32 %v2113_v4  ;;  %v2106_v12 = vpop.xlane.xlu1 %2105  ;;  %v2103_v6 = vpop.xlane.xlu0 %2102 }
0x1523   :  { %3909 = vpow2.f32 %v2111_v31  ;;  %v2110_v8 = vsub.f32 %v2094_v22, %v2106_v12  ;;  %v2109_v10 = vsub.f32 %v2093_v26, %v2103_v6 }
0x1525   :  { %v2117_v11 = vmul.f32 1.442695, %v2110_v8  ;;  %v2115_v9 = vmul.f32 1.442695, %v2109_v10 }
0x1527   :  { %3911 = vpow2.f32 %v2117_v11 }
0x1528   :  { %3913 = vpow2.f32 %v2115_v9 }
0x152c   :  { %v3908_v2 = vpop.eup %3907 }
0x152d   :  { %v3910_v21 = vpop.eup %3909  ;;  %v2122_v62 = vsel %vm205_vm4, %v3908_v2, 0.0 }
0x152e   :  { %2123 = vadd.xlane.f32.xlu1 %v2122_v62  ;;  %v2119_v34 = vsel %vm205_vm4, %v3910_v21, 0.0 }
0x152f   :  { %2120 = vadd.xlane.f32.xlu0 %v2119_v34 }
0x1531   :  { %v3912_v13 = vpop.eup %3911 }
0x1532   :  { %v3914_v28 = vpop.eup %3913  ;;  %v2128_v5 = vsel %vm205_vm4, %v3912_v13, 0.0 }
0x1533   :  { %2129 = vadd.xlane.f32.xlu1 %v2128_v5  ;;  %v2125_v25 = vsel %vm205_vm4, %v3914_v28, 0.0 }
0x1534   :  { %2126 = vadd.xlane.f32.xlu0 %v2125_v25 }
0x1544   :  { %3819 = vrot.lane.b32.xlu1 %v4536_v7, %s3959_s29 }
0x154a   :  { %3814 = vrot.lane.b32.xlu0 %v4526_v33, %s3959_s29 }
0x15bb   :  { %v2124_v15 = vpop.xlane.xlu1 %2123 }
0x15bc   :  { %v2121_v17 = vpop.xlane.xlu0 %2120 }
0x15bd   :  { %3915 = vrcp.f32 %v2121_v17 }
0x15be   :  { %3917 = vrcp.f32 %v2124_v15 }
0x15c0   :  { %v2130_v18 = vpop.xlane.xlu1 %2129 }
0x15c1   :  { %v2127_v19 = vpop.xlane.xlu0 %2126 }
0x15c2   :  { %3919 = vrcp.f32 %v2127_v19 }
0x15c3   :  { %3921 = vrcp.f32 %v2130_v18 }
0x15c4   :  { %v3820_v37 = vpop.permute.xlu1 %3819 }
0x15c5   :  { %v3815_v36 = vpop.permute.xlu0 %3814  ;;  %v3822_v20 = vunpack.i.h.bf16 %v3820_v37  ;;  %v3821_v58 = vunpack.i.l.bf16 %v3820_v37 }
0x15c6   :  { %v3817_v30 = vunpack.i.h.bf16 %v3815_v36  ;;  %v3816_v32 = vunpack.i.l.bf16 %v3815_v36 }
0x15c7   :  { %v3916_v61 = vpop.eup %3915  ;;  %v3679_v38 = vpack.c.bf16 %v3822_v20, %v3821_v58 }
0x15c8   :  { %v3675_v35 = vpack.c.bf16 %v3817_v30, %v3816_v32  ;;  %v2132_v7 = vmul.f32 %v3916_v61, %v3910_v21  ;;  %v3918_v33 = vpop.eup %3917 }
0x15c9   :  { %v2134_v23 = vmul.f32 %v3918_v33, %v3908_v2  ;;  %v3077_v33 = vld [vmem:[%s4805_s16 + $0x28] sm:$0xff] }
0x15ca   :  { %3676 = vmatprep.subr.bf16.mxu0 %v3675_v35  ;;  %3465 = vmatprep.mubr.msk.f32.mxu0 %vm205_vm4, %v2132_v7 }
0x15cb   :  { %3678 = vmatpush3.bf16.msra.mxu0 %v3675_v35 }
0x15cc   :  { %3680 = vmatprep.subr.bf16.mxu0 %v3679_v38  ;;  %v3920_v39 = vpop.eup %3919 }
0x15cd   :  { %v3922_v40 = vpop.eup %3921  ;;  %v2136_v45 = vmul.f32 %v3920_v39, %v3914_v28 }
0x15ce   :  { %v2138_v24 = vmul.f32 %v3922_v40, %v3912_v13  ;;  %v3079_v40 = vld [vmem:[%s4805_s16 + $0x38] sm:$0xff] }
0x15cf   :  { %3682 = vmatpush3.bf16.msra.mxu0 %v3679_v38  ;;  %v3076_v38 = vld [vmem:[%s4805_s16 + $0x20] sm:$0xff] }
0x15d0   :  { %3684 = vmatprep.subr.bf16.mxu0 %v3683_v49  ;;  %v3691_v39 = vpack.c.bf16 %v3077_v33, %v3076_v38 }
0x15d2   :  { %3466 = vmatmul.mubr.msk.f32.vlgmr.msra.gmra.mrb[22].mxu0 %vm205_vm4, %v2134_v23  ;;  %v3078_v23 = vld [vmem:[%s4805_s16 + $0x30] sm:$0xff]  ;;  %3692 = vmatprep.subr.bf16.mxu1 %v3691_v39 }
0x15d3   :  { %3468 = vmatprep.mubr.msk.f32.mxu0 %vm205_vm4, %v2136_v45  ;;  %3686 = vmatpush3.bf16.msra.mxu0 %v3683_v49  ;;  %v3695_v45 = vpack.c.bf16 %v3079_v40, %v3078_v23 }
0x15d4   :  { %3688 = vmatprep.subr.bf16.mxu0 %v3687_v51  ;;  %3694 = vmatpush3.bf16.msra.mxu1 %v3691_v39 }
0x15d5   :  { %3696 = vmatprep.subr.bf16.mxu1 %v3695_v45 }
0x15d6   :  { %3469 = vmatmul.mubr.msk.f32.gmra.mrb[24].mxu0 %vm205_vm4, %v2138_v24 }
0x15d7   :  { %3690 = vmatpush3.bf16.msra.mxu0 %v3687_v51 }
0x15d8   :  { %3698 = vmatpush3.bf16.msra.mxu1 %v3695_v45 }
0x16a5   :  { %v3467_v52 = vpop.f32.mrb[22].mxu0 }
0x16a6   :  { %2254 = vrot.lane.b32.xlu0 %v3467_v52, %s4851_s0  ;;  %v2229_v53 = vpop.f32.mrb[23].mxu0 }
0x16a7   :  { %2252 = vrot.lane.b32.xlu1 %v2229_v53, %s4851_s0 }
0x16a9   :  { %v3470_v54 = vpop.f32.mrb[24].mxu0 }
0x16aa   :  { %2258 = vrot.lane.b32.xlu0 %v3470_v54, %s4851_s0  ;;  %v2239_v55 = vpop.f32.mrb[25].mxu0 }
0x16ab   :  { %2256 = vrot.lane.b32.xlu1 %v2239_v55, %s4851_s0 }
0x1718   :  { %v2255_v22 = vpop.permute.xlu0 %2254 }
0x1719   :  { %v2253_v26 = vpop.permute.xlu1 %2252  ;;  %v2265_v59 = vsel %vm368_vm6, %v4598_v42, %v2255_v22  ;;  %v3067_v42 = vld [vmem:[%s4804_s13 + $0x1] ss:$0 sm:$0xff] }
0x171a   :  { %v2264_v56 = vsel %vm368_vm6, %v4600_v41, %v2253_v26 }
0x171b   :  { %3479 = vmatprep.mubr.msk.f32.mxu0 %vm205_vm4, %v2264_v56  ;;  %v3074_v56 = vld [vmem:[%s4806_s14 + $0x1] ss:$0 sm:$0xff] }
0x171c   :  { %3480 = vmatmul.mubr.msk.f32.vlgmr.msra.gmra.mrb[26].mxu0 %vm205_vm4, %v2265_v59  ;;  %v2259_v0 = vpop.permute.xlu0 %2258 }
0x171d   :  { %v2257_v29 = vpop.permute.xlu1 %2256  ;;  %v2267_v3 = vsel %vm368_vm6, %v4602_v43, %v2259_v0 }
0x171e   :  { %v2266_v63 = vsel %vm368_vm6, %v4604_v44, %v2257_v29  ;;  %vm2964_vm6 = vcmask 1042432  }
0x171f   :  { %3482 = vmatprep.mubr.msk.f32.mxu0 %vm205_vm4, %v2266_v63  ;;  %v3075_v63 = vld [vmem:[%s4807_s15 + $0x1] ss:$0 sm:$0xff] }
0x1720   :  { %3483 = vmatmul.mubr.msk.f32.gmra.mrb[28].mxu0 %vm205_vm4, %v2267_v3 }
0x17ef   :  { %v3481_v41 = vpop.f32.mrb[26].mxu0 }
0x17f0   :  { %v2365_v4 = vadd.f32 %v3481_v41, %v3067_v42  ;;  %v2359_v31 = vpop.f32.mrb[27].mxu0 }
0x17f1   :  { %v2360_v12 = vadd.f32 %v3067_v42, %v2359_v31 }
0x17f2   :  { %v2379_v6 = vadd.f32 %v2365_v4, %v4501_v60 }
0x17f3   :  { %v3484_v8 = vpop.f32.mrb[28].mxu0  ;;  %v2378_v44 = vadd.f32 %v2360_v12, %v4499_v57 }
0x17f4   :  { %v2375_v10 = vadd.f32 %v3484_v8, %v3067_v42  ;;  %v2369_v11 = vpop.f32.mrb[29].mxu0  ;;  %v2389_v43 = vsel %vm205_vm4, %v2379_v6, 0.0 }
0x17f5   :  { %v2370_v9 = vadd.f32 %v3067_v42, %v2369_v11  ;;  %2390 = vadd.xlane.f32.xlu0 %v2389_v43  ;;  %v2386_v2 = vsel %vm205_vm4, %v2378_v44, 0.0 }
0x17f6   :  { %2387 = vadd.xlane.f32.xlu1 %v2386_v2  ;;  %v2381_v21 = vadd.f32 %v2375_v10, %v4509_v1  ;;  %v3087_v2 = vld [vmem:[%s4808_s18 + $0x48] sm:$0xff] }
0x17f7   :  { %v2380_v62 = vadd.f32 %v2370_v9, %v4507_v27  ;;  %v3086_v9 = vld [vmem:[%s4808_s18 + $0x40] sm:$0xff] }
0x17f8   :  { %v2395_v34 = vsel %vm205_vm4, %v2381_v21, 0.0 }
0x17f9   :  { %v2392_v60 = vsel %vm205_vm4, %v2380_v62, 0.0 }
0x17fa   :  { %2393 = vadd.xlane.f32.xlu0 %v2392_v60  ;;  %2396 = vadd.xlane.f32.xlu1 %v2395_v34  ;;  %v3089_v34 = vld [vmem:[%s4808_s18 + $0x58] sm:$0xff] }
0x1882   :  { %v2391_v57 = vpop.xlane.xlu0 %2390 }
0x1883   :  { %v2399_v13 = vmul.f32 0.03125, %v2391_v57  ;;  %v2388_v28 = vpop.xlane.xlu1 %2387  ;;  %v3090_v57 = vld [vmem:[%s4808_s18 + $0x60] sm:$0xff] }
0x1884   :  { %v2398_v5 = vmul.f32 0.03125, %v2388_v28 }
0x1885   :  { %v2403_v25 = vsub.f32 %v2379_v6, %v2399_v13  ;;  %v3091_v13 = vld [vmem:[%s4808_s18 + $0x68] sm:$0xff] }
0x1886   :  { %v2402_v15 = vsub.f32 %v2378_v44, %v2398_v5  ;;  %v3707_v28 = vpack.c.bf16 %v3091_v13, %v3090_v57  ;;  %v3092_v5 = vld [vmem:[%s4808_s18 + $0x70] sm:$0xff] }
0x1887   :  { %v2394_v17 = vpop.xlane.xlu0 %2393  ;;  %v2397_v18 = vpop.xlane.xlu1 %2396  ;;  %v2407_v19 = vmul.f32 %v2403_v25, %v2403_v25 }
0x1888   :  { %v2400_v37 = vmul.f32 0.03125, %v2394_v17  ;;  %v2401_v36 = vmul.f32 0.03125, %v2397_v18  ;;  %v2406_v1 = vmul.f32 %v2402_v15, %v2402_v15  ;;  %v3081_v17 = vld [vmem:[%s4809_s17 + $0x1] ss:$0 sm:$0xff] }
0x1889   :  { %v2413_v27 = vsel %vm205_vm4, %v2407_v19, 0.0 }
0x188a   :  { %v2404_v20 = vsub.f32 %v2380_v62, %v2400_v37  ;;  %v2405_v58 = vsub.f32 %v2381_v21, %v2401_v36  ;;  %2414 = vadd.xlane.f32.xlu1 %v2413_v27  ;;  %v2410_v30 = vsel %vm205_vm4, %v2406_v1, 0.0  ;;  %v3699_v21 = vpack.c.bf16 %v3087_v2, %v3086_v9  ;;  %v3088_v62 = vld [vmem:[%s4808_s18 + $0x50] sm:$0xff]  ;;  %v2754_v2 = vld [vmem:[%s4813_s22 + $0x8] sm:$0xff] }
0x188b   :  { %2411 = vadd.xlane.f32.xlu0 %v2410_v30  ;;  %v3703_v60 = vpack.c.bf16 %v3089_v34, %v3088_v62  ;;  %v3961_v62 = vmov 0.0|0.0   ;;  %v2755_v34 = vld [vmem:[%s4813_s22 + $0x10] sm:$0xff] }
0x188c   :  { %v2408_v32 = vmul.f32 %v2404_v20, %v2404_v20  ;;  %v2409_v61 = vmul.f32 %v2405_v58, %v2405_v58  ;;  %3700 = vmatprep.subr.bf16.mxu0 %v3699_v21  ;;  %3715 = vmatprep.subr.bf16.mxu1 %v3961_v62 }
0x188d   :  { %3702 = vmatpush3.bf16.msra.mxu0 %v3699_v21 }
0x188e   :  { %v2416_v35 = vsel %vm205_vm4, %v2408_v32, 0.0  ;;  %v2419_v7 = vsel %vm205_vm4, %v2409_v61, 0.0  ;;  %3704 = vmatprep.subr.bf16.mxu0 %v3703_v60 }
0x188f   :  { %2417 = vadd.xlane.f32.xlu0 %v2416_v35  ;;  %2420 = vadd.xlane.f32.xlu1 %v2419_v7 }
0x1891   :  { %3706 = vmatpush3.bf16.msra.mxu0 %v3703_v60  ;;  %v2756_v60 = vld [vmem:[%s4813_s22 + $0x18] sm:$0xff] }
0x1892   :  { %3708 = vmatprep.subr.bf16.mxu0 %v3707_v28  ;;  %v3719_v57 = vpack.c.bf16 %v2756_v60, %v2755_v34 }
0x1895   :  { %3710 = vmatpush3.bf16.msra.mxu0 %v3707_v28 }
0x1917   :  { %v2415_v24 = vpop.xlane.xlu1 %2414 }
0x1918   :  { %v2423_v46 = vmul.f32 0.03125, %v2415_v24  ;;  %v2412_v47 = vpop.xlane.xlu0 %2411 }
0x1919   :  { %v2422_v48 = vmul.f32 0.03125, %v2412_v47 }
0x191a   :  { %v2427_v49 = vadd.f32 1e-12, %v2423_v46 }
0x191b   :  { %v2426_v50 = vadd.f32 1e-12, %v2422_v48 }
0x191c   :  { %3923 = vrsqrt.f32 %v2427_v49  ;;  %v2418_v51 = vpop.xlane.xlu0 %2417  ;;  %v2421_v52 = vpop.xlane.xlu1 %2420 }
0x191d   :  { %3925 = vrsqrt.f32 %v2426_v50  ;;  %v2424_v53 = vmul.f32 0.03125, %v2418_v51  ;;  %v2425_v54 = vmul.f32 0.03125, %v2421_v52 }
0x191f   :  { %v2428_v55 = vadd.f32 1e-12, %v2424_v53  ;;  %v2429_v22 = vadd.f32 1e-12, %v2425_v54  ;;  %v3095_v54 = vld [vmem:[%s4810_s19 + $0x1] ss:$0 sm:$0xff] }
0x1921   :  { %3927 = vrsqrt.f32 %v2428_v55 }
0x1922   :  { %3929 = vrsqrt.f32 %v2429_v22 }
0x1926   :  { %v3924_v26 = vpop.eup %3923 }
0x1927   :  { %v3926_v59 = vpop.eup %3925  ;;  %v2435_v0 = vmul.f32 %v3924_v26, %v2403_v25  ;;  %v3093_v25 = vld [vmem:[%s4808_s18 + $0x78] sm:$0xff] }
0x1928   :  { %v2434_v29 = vmul.f32 %v3926_v59, %v2402_v15  ;;  %v3711_v15 = vpack.c.bf16 %v3093_v25, %v3092_v5 }
0x1929   :  { %v2445_v3 = vmul.f32 %v3074_v56, %v2435_v0 }
0x192a   :  { %v2444_v42 = vmul.f32 %v3074_v56, %v2434_v29  ;;  %3712 = vmatprep.subr.bf16.mxu0 %v3711_v15 }
0x192b   :  { %v3928_v41 = vpop.eup %3927  ;;  %v2455_v6 = vadd.f32 %v3075_v63, %v2445_v3  ;;  %3714 = vmatpush3.bf16.msra.mxu0 %v3711_v15 }
0x192c   :  { %v3930_v4 = vpop.eup %3929  ;;  %v4687_v31 = vadd.f32 %v3075_v63, %v2444_v42  ;;  %v2436_v12 = vmul.f32 %v3928_v41, %v2404_v20 }
0x192d   :  { %v2437_v8 = vmul.f32 %v3930_v4, %v2405_v58 }
0x192e   :  { %3493 = vmatprep.mubr.msk.f32.mxu1 %vm205_vm4, %v4687_v31  ;;  %v2446_v44 = vmul.f32 %v3074_v56, %v2436_v12 }
0x192f   :  { %3494 = vmatmul.mubr.msk.f32.vlgmr.msra.gmra.mrb[28].mxu1 %vm205_vm4, %v2455_v6  ;;  %v2447_v10 = vmul.f32 %v3074_v56, %v2437_v8 }
0x1930   :  { %v4692_v11 = vadd.f32 %v3075_v63, %v2446_v44 }
0x1931   :  { %v2457_v43 = vadd.f32 %v3075_v63, %v2447_v10 }
0x1932   :  { %3496 = vmatprep.mubr.msk.f32.mxu1 %vm205_vm4, %v4692_v11 }
0x1933   :  { %3497 = vmatmul.mubr.msk.f32.gmra.mrb[30].mxu1 %vm205_vm4, %v2457_v43 }
0x1934   :  { %3529 = vmatprep.mubr.msk.f32.mxu1 %vm3962_vm15, %v3950_v16 }
0x1a02   :  { %v3495_v18 = vpop.f32.mrb[28].mxu1 }
0x1a03   :  { %v2555_v19 = vadd.f32 %v3495_v18, %v3081_v17  ;;  %v2549_v37 = vpop.f32.mrb[29].mxu1 }
0x1a04   :  { %v2550_v36 = vadd.f32 %v3081_v17, %v2549_v37 }
0x1a05   :  { %v2573_v1 = vmul.f32 0.70710677, %v2555_v19  ;;  %v2569_v40 = vmul.f32 0.5, %v2555_v19 }
0x1a06   :  { %v2572_v27 = vmul.f32 0.70710677, %v2550_v36  ;;  %v3498_v20 = vpop.f32.mrb[30].mxu1  ;;  %v2568_v39 = vmul.f32 0.5, %v2550_v36  ;;  %v3102_v36 = vld [vmem:[%s4811_s20 + $0x1] ss:$0 sm:$0xff] }
0x1a07   :  { %3931 = verf.f32 %v2573_v1  ;;  %v2565_v58 = vadd.f32 %v3498_v20, %v3081_v17  ;;  %v2559_v30 = vpop.f32.mrb[31].mxu1 }
0x1a08   :  { %3933 = verf.f32 %v2572_v27  ;;  %v2560_v32 = vadd.f32 %v3081_v17, %v2559_v30 }
0x1a09   :  { %v2575_v61 = vmul.f32 0.70710677, %v2565_v58  ;;  %v2571_v51 = vmul.f32 0.5, %v2565_v58  ;;  %v3103_v58 = vld [vmem:[%s4812_s21 + $0x1] ss:$0 sm:$0xff] }
0x1a0a   :  { %v2574_v35 = vmul.f32 0.70710677, %v2560_v32  ;;  %v2570_v49 = vmul.f32 0.5, %v2560_v32 }
0x1a0b   :  { %3935 = verf.f32 %v2575_v61 }
0x1a0c   :  { %3937 = verf.f32 %v2574_v35 }
0x1a11   :  { %v3932_v7 = vpop.eup %3931 }
0x1a12   :  { %v3934_v38 = vpop.eup %3933  ;;  %v2581_v33 = vadd.f32 1.0, %v3932_v7  ;;  %v2838_v7 = vld [vmem:[%s4814_s24] sm:$0xff] }
0x1a13   :  { %v2580_v23 = vadd.f32 1.0, %v3934_v38  ;;  %v2839_v38 = vld [vmem:[%s4814_s24 + $0x8] sm:$0xff] }
0x1a14   :  { %v2585_v47 = vmul.f32 %v2581_v33, %v2569_v40  ;;  %v2840_v33 = vld [vmem:[%s4814_s24 + $0x10] sm:$0xff] }
0x1a15   :  { %v3936_v45 = vpop.eup %3935  ;;  %v2584_v24 = vmul.f32 %v2580_v23, %v2568_v39  ;;  %v3722_v39 = vpack.c.bf16 %v2839_v38, %v2838_v7  ;;  %v2841_v23 = vld [vmem:[%s4814_s24 + $0x18] sm:$0xff] }
0x1a16   :  { %v3938_v46 = vpop.eup %3937  ;;  %v2583_v48 = vadd.f32 1.0, %v3936_v45  ;;  %v3725_v40 = vpack.c.bf16 %v2841_v23, %v2840_v33  ;;  %v3104_v45 = vld [vmem:[%s4815_s23] ss:$0 sm:$0xff] }
0x1a17   :  { %v2582_v50 = vadd.f32 1.0, %v3938_v46  ;;  %3515 = vmatprep.mubr.msk.f32.mxu0 %vm1410_vm14, %v2584_v24 }
0x1a18   :  { %3516 = vmatmul.mubr.msk.f32.vlgmr.msra.gmra.mrb[30].mxu0 %vm1410_vm14, %v2585_v47  ;;  %v2587_v53 = vmul.f32 %v2583_v48, %v2571_v51 }
0x1a19   :  { %v2586_v52 = vmul.f32 %v2582_v50, %v2570_v49  ;;  %v3106_v49 = vld [vmem:[%s4816_s25] ss:$0 sm:$0xff] }
0x1a1b   :  { %3518 = vmatprep.mubr.msk.f32.mxu0 %vm1410_vm14, %v2586_v52 }
0x1a1c   :  { %3519 = vmatmul.mubr.msk.f32.gmra.mrb[32].mxu0 %vm1410_vm14, %v2587_v53 }
0x1aeb   :  { %v3517_v55 = vpop.f32.mrb[30].mxu0 }
0x1aec   :  { %v2683_v22 = vpop.f32.mrb[31].mxu0 }
0x1aed   :  { %v2684_v26 = vadd.f32 %v3095_v54, %v2683_v22 }
0x1aef   :  { %v2700_v56 = vadd.f32 %v2684_v26, %v4687_v31  ;;  %v3520_v59 = vpop.f32.mrb[32].mxu0 }
0x1af0   :  { %v2692_v0 = vpop.f32.mrb[33].mxu0 }
0x1af1   :  { %v2693_v29 = vadd.f32 %v3095_v54, %v2692_v0  ;;  %v2706_v63 = vsel %vm205_vm4, %v2700_v56, 0.0  ;;  %v2936_v54 = vld [vmem:[%s4817_s3] sm:$0x3] }
0x1af2   :  { %2707 = vadd.xlane.f32.xlu1 %v2706_v63 }
0x1af3   :  { %v2701_v3 = vadd.f32 %v2693_v29, %v4692_v11  ;;  %v2753_v11 = vld [vmem:[%s4813_s22] sm:$0xff] }
0x1af4   :  { %v3716_v21 = vpack.c.bf16 %v2754_v2, %v2753_v11 }
0x1af5   :  { %v2709_v42 = vsel %vm205_vm4, %v2701_v3, 0.0 }
0x1af6   :  { %2710 = vadd.xlane.f32.xlu0 %v2709_v42  ;;  %3717 = vmatpush3.bf16.msra.mxu1 %v3716_v21 }
0x1af7   :  { %3718 = vmatprep.subr.bf16.mxu1 %v3961_v62 }
0x1afa   :  { %3720 = vmatpush3.bf16.msra.mxu1 %v3719_v57 }
0x1afb   :  { %3721 = vmatprep.subr.bf16.mxu1 %v3961_v62 }
0x1b7f   :  { %v2708_v41 = vpop.xlane.xlu1 %2707 }
0x1b80   :  { %v2712_v4 = vmul.f32 0.03125, %v2708_v41 }
0x1b82   :  { %v2714_v12 = vsub.f32 %v2700_v56, %v2712_v4 }
0x1b83   :  { %v2711_v6 = vpop.xlane.xlu0 %2710 }
0x1b84   :  { %v2713_v8 = vmul.f32 0.03125, %v2711_v6  ;;  %v2716_v44 = vmul.f32 %v2714_v12, %v2714_v12 }
0x1b86   :  { %v2715_v10 = vsub.f32 %v2701_v3, %v2713_v8  ;;  %v2718_v31 = vsel %vm205_vm4, %v2716_v44, 0.0 }
0x1b87   :  { %2719 = vadd.xlane.f32.xlu1 %v2718_v31 }
0x1b88   :  { %v2717_v43 = vmul.f32 %v2715_v10, %v2715_v10 }
0x1b8a   :  { %v2721_v9 = vsel %vm205_vm4, %v2717_v43, 0.0 }
0x1b8b   :  { %2722 = vadd.xlane.f32.xlu0 %v2721_v9 }
0x1c14   :  { %v2720_v13 = vpop.xlane.xlu1 %2719 }
0x1c15   :  { %v2724_v28 = vmul.f32 0.03125, %v2720_v13 }
0x1c17   :  { %v2726_v5 = vadd.f32 1e-12, %v2724_v28 }
0x1c18   :  { %v2723_v25 = vpop.xlane.xlu0 %2722 }
0x1c19   :  { %3939 = vrsqrt.f32 %v2726_v5  ;;  %v2725_v15 = vmul.f32 0.03125, %v2723_v25 }
0x1c1b   :  { %v2727_v17 = vadd.f32 1e-12, %v2725_v15 }
0x1c1d   :  { %3941 = vrsqrt.f32 %v2727_v17 }
0x1c23   :  { %v3940_v18 = vpop.eup %3939 }
0x1c24   :  { %v2730_v19 = vmul.f32 %v3940_v18, %v2714_v12 }
0x1c26   :  { %v2738_v27 = vmul.f32 %v3102_v36, %v2730_v19 }
0x1c27   :  { %v3942_v37 = vpop.eup %3941 }
0x1c28   :  { %v2731_v1 = vmul.f32 %v3942_v37, %v2715_v10  ;;  %v2746_v32 = vadd.f32 %v3103_v58, %v2738_v27 }
0x1c2a   :  { %v2739_v20 = vmul.f32 %v3102_v36, %v2731_v1 }
0x1c2c   :  { %v2747_v30 = vadd.f32 %v3103_v58, %v2739_v20 }
0x1c2e   :  { %v2749_v61 = vrot.slane %v2747_v30, 7 }
0x1c30   :  { %v2752_v35 = vsel %vm2751_vm1, %v2746_v32, %v2749_v61 }
0x1c31   :  { %3530 = vmatmul.mubr.msk.f32.vlgmr.msra.gmra.mrb[32].mxu1 %vm205_vm4, %v2752_v35 }
0x1c32   :  { %3540 = vmatprep.mubr.msk.f32.mxu1 %vm3962_vm15, %v3950_v16  ;;  %3723 = vmatpush3.bf16.msra.mxu1 %v3722_v39 }
0x1c33   :  { %3724 = vmatprep.subr.bf16.mxu1 %v3961_v62 }
0x1c36   :  { %3726 = vmatpush3.bf16.msra.mxu1 %v3725_v40 }
0x1d04   :  { %v2833_v24 = vpop.f32.mrb[32].mxu1 }
0x1d05   :  { %v2834_v46 = vadd.f32 %v3104_v45, %v2833_v24  ;;  %v3531_v47 = vpop.f32.mrb[33].mxu1 }
0x1d07   :  { %3943 = vtanh.f32 %v2834_v46 }
0x1d11   :  { %v3944_v48 = vpop.eup %3943 }
0x1d12   :  { %3541 = vmatmul.mubr.msk.f32.vlgmr.msra.gmra.mrb[34].mxu1 %vm205_vm4, %v3944_v48  ;;  %vm2958_vm4 = vcmask 7168  }
0x1de5   :  { %v2918_v50 = vpop.f32.mrb[34].mxu1 }
0x1de6   :  { %v2919_v51 = vadd.f32 %v3106_v49, %v2918_v50  ;;  %v3542_v52 = vpop.f32.mrb[35].mxu1 }
0x1de8   :  { %v2923_v53 = vsel %vm2922_vm2, %v2919_v51, -inf  ;;  %v2957_v34 = vsel %vm2956_vm5, %v2919_v51, 0.0 }
0x1de9   :  { %2924 = vmax.xlane.f32.xlu0 %v2923_v53 }
0x1dff   :  { %2938 = vperm.xlu0 %3741, %v2936_v54  }
0x1e76   :  { %v2925_v55 = vpop.xlane.xlu0 %2924 }
0x1e77   :  { %v2926_v22 = vsub.f32 %v2919_v51, %v2925_v55 }
0x1e79   :  { %v2927_v26 = vmul.f32 1.442695, %v2926_v22 }
0x1e7b   :  { %3945 = vpow2.f32 %v2927_v26 }
0x1e7e   :  { %v2939_v63 = vpop.permute.xlu0 %2938 }
0x1e7f   :  { %vm2940_vm3 = vcmp.eq.s32.totalorder %v4127_v14, %v2939_v63 }
0x1e80   :  { %v3108_v4 = vsel %vm2940_vm3, 1.0, %v3950_v16 }
0x1e85   :  { %v3946_v56 = vpop.eup %3945 }
0x1e86   :  { %v2929_v59 = vsel %vm2922_vm2, %v3946_v56, 0.0 }
0x1e87   :  { %2930 = vadd.xlane.f32.xlu1 %v2929_v59 }
0x1f14   :  { %v2931_v0 = vpop.xlane.xlu1 %2930 }
0x1f15   :  { %3947 = vlog2.f32 %v2931_v0 }
0x1f1f   :  { %v3948_v29 = vpop.eup %3947 }
0x1f20   :  { %v2933_v3 = vmul.f32 0.6931472, %v3948_v29 }
0x1f22   :  { %v2934_v42 = vadd.f32 %v2933_v3, %v2925_v55 }
0x1f24   :  { %v2935_v41 = vsub.f32 %v2919_v51, %v2934_v42 }
0x1f26   :  { %v2943_v12 = vmul.f32 %v3108_v4, %v2935_v41 }
0x1f28   :  { %v2944_v6 = vsel %vm2922_vm2, %v2943_v12, 0.0 }
0x1f29   :  { %2945 = vadd.xlane.f32.xlu1 %v2944_v6 }
0x1fb6   :  { %v2946_v8 = vpop.xlane.xlu1 %2945 }
0x1fb7   :  { %v2947_v44 = vsub.f32 0.0, %v2946_v8 }
0x1fb9   :  { %v2948_v10 = vsel %vm118_vm0, %v2947_v44, 0.0 }
0x1fba   :  { %v2949_v31 = vrot.slane %v2948_v10, 4 }
0x1fbc   :  { %v2950_v43 = vadd.f32 %v2949_v31, %v2948_v10 }
0x1fbe   :  { %v2951_v9 = vrot.slane %v2950_v43, 2 }
0x1fc0   :  { %v2952_v11 = vadd.f32 %v2951_v9, %v2950_v43 }
0x1fc2   :  { %v2953_v2 = vrot.slane %v2952_v11, 1 }
0x1fc4   :  { %v2954_v21 = vadd.f32 %v2953_v2, %v2952_v11 }
0x1fc6   :  { %v2955_v14 = vmul.f32 0.5, %v2954_v21 }
0x1fc8   :  { %v2959_v62 = vsel %vm2958_vm4, %v2955_v14, 0.0 }
0x1fc9   :  { %v2961_v16 = vrot.slane %v2959_v62, 6 }
0x1fcb   :  { %v2963_v60 = vsel %vm118_vm0, %v2957_v34, %v2961_v16 }
0x1fcc   :  { %v2965_v57 = vsel %vm2964_vm6, %v2963_v60, 0.0 }
0x1fcd   :  { %2966 = vst [vmem:[%s4818_s26] sm:$0xff] %v2965_v57 }

</bundles_post_ra>
